<compile_context>
chip_gen: v7x
topology: tpu7x:2x2x1
jax: 0.10.0
libtpu: 0.0.40
codegen_flags: <defaults>
</compile_context>

<pallas_src>
import functools

import jax
import jax.numpy as jnp
import numpy as np
from jax import lax
from jax.experimental import pallas as pl
from jax.experimental.pallas import tpu as pltpu


# ----------------------------- Pallas kernels ------------------------------ #

def _upsample_conv_kernel(x_ref, w_ref, b_ref, o_ref, *, fuse_cols, cdt, n_ct):
    """Fused nearest-2x upsample + 3x3 conv (pad=1), phase decomposed.

    x_ref: (H, W, Cin)     raw un-padded image (f32 or bf16), resident per batch
    w_ref: fuse_cols -> (2, 6*Cin, 2*Cout)   phase-combined weights (cdt)
           else      -> (2, 2, 4*Cin, Ct)    Ct = Cout tile
    b_ref: fuse_cols -> (1, 2*Cout) f32      else (1, Ct) f32
    o_ref: (TH, 2, W, 2*Cout)  o[i, a, j, b*Cout+c] = y[2i+a, 2j+b, c]
    """
    th, _, w, c2 = o_ref.shape
    cout = c2 // 2
    h, _, cin = x_ref.shape
    ht = pl.program_id(1)
    cidx = pl.program_id(2)

    # ---- padded (TH+2, W+2, Cin) window: halo taken in-kernel (no prepass),
    # bf16 (cdt) end-to-end from the load onward.
    r0 = pl.multiple_of(ht * th, th)
    mid = x_ref[pl.ds(r0, th)].astype(cdt)                         # (TH, W, Cin)
    top = x_ref[pl.ds(jnp.maximum(r0 - 1, 0), 1)].astype(cdt)      # (1, W, Cin)
    bot = x_ref[pl.ds(jnp.minimum(r0 + th, h - 1), 1)].astype(cdt)
    top = jnp.where(ht == 0, jnp.zeros_like(top), top)
    bot = jnp.where(ht == pl.num_programs(1) - 1, jnp.zeros_like(bot), bot)
    win = jnp.concatenate([top, mid, bot], axis=0)                 # (TH+2, W, Cin)
    zcol = jnp.zeros((th + 2, 1, cin), cdt)
    win = jnp.concatenate([zcol, win, zcol], axis=1)               # (TH+2, W+2, Cin)

    bias = b_ref[...]                                              # f32

    if fuse_cols:
        # Small-channel path: one matmul per row phase, K = 6*Cin, N = 2*Cout.
        for a in range(2):
            patch = jnp.concatenate(
                [win[a + r:a + r + th, s:s + w, :]
                 for r in range(2) for s in range(3)],
                axis=-1).reshape(th * w, 6 * cin)
            acc = jnp.dot(patch, w_ref[a],
                          preferred_element_type=jnp.float32) + bias
            # one dense slab store per row phase (lane-dense once 2*Cout>=128)
            o_ref[:, a] = acc.reshape(th, w, 2 * cout).astype(o_ref.dtype)
    else:
        # Wide-channel path: K = 4*Cin per (a, b); row slabs sliced once per a.
        ct = w_ref.shape[-1]
        for a in range(2):
            r_lo = win[a:a + th]                  # (TH, W+2, Cin)
            r_hi = win[a + 1:a + 1 + th]
            for b in range(2):
                patch = jnp.concatenate(
                    [r_lo[:, b:b + w], r_lo[:, b + 1:b + 1 + w],
                     r_hi[:, b:b + w], r_hi[:, b + 1:b + 1 + w]],
                    axis=-1).reshape(th * w, 4 * cin)
                acc = jnp.dot(patch, w_ref[a, b],
                              preferred_element_type=jnp.float32) + bias
                val = acc.reshape(th, w, ct).astype(o_ref.dtype)
                if n_ct == 1:
                    # static lane slice (the common / tested case)
                    o_ref[:, a, :, b * cout:(b + 1) * cout] = val
                else:
                    # Cout-tiled weights: each ct step fills its lane range of
                    # the resident output block.
                    off = pl.multiple_of(b * cout + cidx * ct, ct)
                    o_ref[:, a, :, pl.ds(off, ct)] = val


def _upsample_kernel(x_ref, o_ref):
    """Nearest-2x upsample only (exact), interleave-ready output layout."""
    x = x_ref[...]
    x2 = jnp.concatenate([x, x], axis=-1)       # both column phases
    o_ref[:, 0] = x2
    o_ref[:, 1] = x2


# ------------------------------ tile planning ------------------------------ #

@functools.lru_cache(maxsize=1)
def _vmem_capacity_bytes():
    try:
        return int(pltpu.get_tpu_info().vmem_capacity_bytes)
    except Exception:
        return 64 * 1024 * 1024      # v7x-safe fallback


def _plan_conv(n, h, w, cin, cout, x_bytes, cd_bytes, out_bytes, fuse_cols):
    """Pick (row tile, Cout tile, #Cout tiles, vmem limit) from a full-residency
    budget (image + weights + output block + in-kernel temporaries, all with
    their double-buffering factors)."""
    cap = _vmem_capacity_bytes()
    budget = int(cap * 0.6)

    if fuse_cols:
        ct = cout
        w_block = 24 * cin * cout * cd_bytes
    else:
        w_cap = 8 << 20
        ct = cout
        if 16 * cin * cout * cd_bytes > w_cap and cout % 128 == 0:
            divs = [d for d in range(128, cout + 1, 128)
                    if cout % d == 0 and 16 * cin * d * cd_bytes <= w_cap]
            if divs:
                ct = max(divs)
        # TODO(synk): if Cout has no 128-multiple divisor the weight block stays
        # un-tiled; restructure (ragged Ct) if that ever busts v7x VMEM.
        w_block = 16 * cin * ct * cd_bytes
    nct = cout // ct

    x_block = h * w * cin * x_bytes
    fixed = 2 * x_block + 2 * w_block + (1 << 16)   # double-buffered residents
    kk = (6 if fuse_cols else 4) * cin

    def live(th):
        out_blk = th * 2 * w * 2 * cout * out_bytes
        win = (th + 2) * (w + 2) * cin * cd_bytes
        patch = th * w * kk * cd_bytes
        acc = th * w * (2 * cout if fuse_cols else ct) * 4
        return 2 * out_blk + win + patch + acc

    th = 1
    for cand in range(1, h + 1):
        if h % cand == 0 and fixed + live(cand) <= budget:
            th = cand
    if th == h and h % 2 == 0 and n < 2:
        th = h // 2                                  # give megacore two row tiles

    est = fixed + live(th)
    vmem_limit = min(int(cap * 0.9), max(32 << 20, est + (8 << 20)))
    return th, ct, nct, vmem_limit


def _plan_plain(n, h, w, c, itemsize):
    cap = _vmem_capacity_bytes()
    budget = int(cap * 0.6)
    th = 1
    for cand in range(1, h + 1):
        if h % cand == 0 and 10 * cand * w * c * itemsize + (1 << 16) <= budget:
            th = cand
    if th == h and h % 2 == 0 and n < 2:
        th = h // 2
    return th, min(int(cap * 0.9), 64 << 20)


# ------------------------------ pallas wrappers ----------------------------- #

def _upsample_conv_pallas(x_nhwc, weff, bias_k, cout, *, fuse_cols,
                          compute_dtype, out_dtype):
    n, h, w, cin = x_nhwc.shape
    th, ct, nct, vmem_limit = _plan_conv(
        n, h, w, cin, cout, x_nhwc.dtype.itemsize,
        np.dtype(compute_dtype).itemsize, np.dtype(out_dtype).itemsize,
        fuse_cols)
    nh = h // th

    if fuse_cols:
        w_spec = pl.BlockSpec((2, 6 * cin, 2 * cout), lambda i, j, c: (0, 0, 0))
        b_spec = pl.BlockSpec((1, 2 * cout), lambda i, j, c: (0, 0))
    else:
        w_spec = pl.BlockSpec((2, 2, 4 * cin, ct), lambda i, j, c: (0, 0, 0, c))
        b_spec = pl.BlockSpec((1, ct), lambda i, j, c: (0, c))

    kernel = functools.partial(_upsample_conv_kernel, fuse_cols=fuse_cols,
                               cdt=compute_dtype, n_ct=nct)

    y5 = pl.pallas_call(
        kernel,
        out_shape=jax.ShapeDtypeStruct((n, h, 2, w, 2 * cout), out_dtype),
        grid=(n, nh, nct),
        in_specs=[
            # raw, un-padded image stays resident per batch element (halo and
            # bf16 cast handled in-kernel -> no pad/cast prepass in HBM)
            pl.BlockSpec((pl.Squeezed(), h, w, cin), lambda i, j, c: (i, 0, 0, 0)),
            w_spec,
            b_spec,
        ],
        out_specs=pl.BlockSpec((pl.Squeezed(), th, 2, w, 2 * cout),
                               lambda i, j, c: (i, j, 0, 0, 0)),
        compiler_params=pltpu.CompilerParams(
            dimension_semantics=("parallel", "parallel", "arbitrary"),
            vmem_limit_bytes=vmem_limit),
    )(x_nhwc, weff, bias_k)
    # (N, H, 2, W, 2*Cout) -> (N, 2H, 2W, Cout) is layout-preserving (free).
    return y5.reshape(n, 2 * h, 2 * w, cout)


def _upsample_pallas(x_nhwc):
    n, h, w, c = x_nhwc.shape
    th, vmem_limit = _plan_plain(n, h, w, c, x_nhwc.dtype.itemsize)
    nh = h // th
    y5 = pl.pallas_call(
        _upsample_kernel,
        out_shape=jax.ShapeDtypeStruct((n, h, 2, w, 2 * c), x_nhwc.dtype),
        grid=(n, nh),
        in_specs=[pl.BlockSpec((pl.Squeezed(), th, w, c),
                               lambda i, j: (i, j, 0, 0))],
        out_specs=pl.BlockSpec((pl.Squeezed(), th, 2, w, 2 * c),
                               lambda i, j: (i, j, 0, 0, 0)),
        compiler_params=pltpu.CompilerParams(
            dimension_semantics=("parallel", "parallel"),
            vmem_limit_bytes=vmem_limit),
    )(x_nhwc)
    return y5.reshape(n, 2 * h, 2 * w, c)


# ------------------------------ module wrapper ----------------------------- #

class Upsample:
    """JAX/Pallas equivalent of the PyTorch Upsample module.

    __call__ keeps the PyTorch NCHW in/out contract; forward_nhwc() is the
    transpose-free path to use when the surrounding model is NHWC.
    compute_dtype/out_dtype default to bf16 (pass jnp.float32 for full parity).
    """

    def __init__(self, channels, use_conv, out_channel=None, *, key=None,
                 compute_dtype=jnp.bfloat16, out_dtype=jnp.bfloat16):
        self.channels = channels
        self.out_channel = out_channel or channels
        self.use_conv = use_conv
        self.compute_dtype = compute_dtype
        self.out_dtype = out_dtype
        if use_conv:
            key = jax.random.PRNGKey(0) if key is None else key
            kw, kb = jax.random.split(key)
            fan_in = channels * 9
            bound = 1.0 / np.sqrt(fan_in)
            # synthetic params; shapes match nn.Conv2d(channels, out_channel, 3)
            self.weight = jax.random.uniform(
                kw, (self.out_channel, channels, 3, 3), jnp.float32, -bound, bound)
            self.bias = jax.random.uniform(
                kb, (self.out_channel,), jnp.float32, -bound, bound)

            # Phase-combined 2x2 kernels, built once.
            w_hwio = jnp.transpose(self.weight, (2, 3, 1, 0))       # (3,3,Ci,Co)
            m = jnp.array([[[1., 0., 0.], [0., 1., 1.]],
                           [[1., 1., 0.], [0., 0., 1.]]], jnp.float32)
            weff_a = jnp.einsum('arh,bsw,hwio->abrsio', m, m, w_hwio)  # (2,2,2,2,Ci,Co)

            # Fuse both column phases into one matmul only while the MXU K dim
            # is shallow (4*Cin < 128); wide channels keep K = 4*Cin per phase.
            self.fuse_cols = 4 * channels < 128
            co = self.out_channel
            if self.fuse_cols:
                w_u = jnp.zeros((2, 2, 3, channels, 2, co), jnp.float32)
                w_u = w_u.at[:, :, 0:2, :, 0, :].set(weff_a[:, 0])
                w_u = w_u.at[:, :, 1:3, :, 1, :].set(weff_a[:, 1])
                self.weff = w_u.reshape(2, 6 * channels, 2 * co).astype(compute_dtype)
                self.bias_k = jnp.tile(self.bias, 2).reshape(1, 2 * co).astype(jnp.float32)
            else:
                self.weff = weff_a.reshape(2, 2, 4 * channels, co).astype(compute_dtype)
                self.bias_k = self.bias.reshape(1, co).astype(jnp.float32)

    def forward_nhwc(self, x_nhwc):
        """Transpose-free NHWC path (no pad/cast prepass; cast happens in-kernel)."""
        assert x_nhwc.shape[-1] == self.channels
        if self.use_conv:
            return _upsample_conv_pallas(
                x_nhwc, self.weff, self.bias_k, self.out_channel,
                fuse_cols=self.fuse_cols, compute_dtype=self.compute_dtype,
                out_dtype=self.out_dtype)
        return _upsample_pallas(x_nhwc)

    def __call__(self, x_nchw):
        assert x_nchw.shape[1] == self.channels
        x_nhwc = jnp.transpose(x_nchw, (0, 2, 3, 1))
        if self.use_conv:
            # the unavoidable NCHW->NHWC transpose carries the bf16 cast for free
            x_nhwc = x_nhwc.astype(self.compute_dtype)
        y_nhwc = self.forward_nhwc(x_nhwc)
        # TODO(synk): emit NCHW directly from the kernel (Cout on the out-block
        # sublane axis + in-kernel XLU transpose / strided stores) to remove
        # this full-output transpose pass; use forward_nhwc() to avoid it today.
        return jnp.transpose(y_nhwc, (0, 3, 1, 2))


# ------------------------------- reference --------------------------------- #

def _reference(x_nchw, use_conv, weight=None, bias=None):
    up = jnp.repeat(jnp.repeat(x_nchw, 2, axis=2), 2, axis=3)
    if use_conv:
        up = lax.conv_general_dilated(
            up, weight, window_strides=(1, 1), padding=((1, 1), (1, 1)),
            dimension_numbers=('NCHW', 'OIHW', 'NCHW'))
        up = up + bias[None, :, None, None]
    return up


# ---------------------------------- main ----------------------------------- #

if __name__ == "__main__":
    key = jax.random.PRNGKey(0)
    kx, kmod, kx2, kmod2 = jax.random.split(key, 4)

    # ---- conv path, small channels (fused column-phase kernel) -------------
    N, C, H, W = 2, 4, 16, 16
    x = jax.random.normal(kx, (N, C, H, W), jnp.float32)
    mod_conv = Upsample(channels=C, use_conv=True, out_channel=C, key=kmod)
    y = jax.block_until_ready(jax.jit(mod_conv.__call__)(x))
    y_ref = _reference(x, True, mod_conv.weight, mod_conv.bias)
    assert y.shape == (N, C, 2 * H, 2 * W)
    np.testing.assert_allclose(np.asarray(y.astype(jnp.float32)),
                               np.asarray(y_ref), rtol=3e-2, atol=3e-2)

    # transpose-free NHWC entry point (f32 input, cast on load, no prepass)
    y_nhwc = jax.block_until_ready(
        jax.jit(mod_conv.forward_nhwc)(jnp.transpose(x, (0, 2, 3, 1))))
    np.testing.assert_allclose(
        np.asarray(jnp.transpose(y_nhwc, (0, 3, 1, 2)).astype(jnp.float32)),
        np.asarray(y_ref), rtol=3e-2, atol=3e-2)

    # ---- conv path, wider channels (K = 4*Cin per-phase kernel) ------------
    C2, H2, W2 = 48, 8, 8
    x2 = jax.random.normal(kx2, (1, C2, H2, W2), jnp.float32)
    mod_conv2 = Upsample(channels=C2, use_conv=True, out_channel=C2, key=kmod2)
    y2 = jax.block_until_ready(jax.jit(mod_conv2.__call__)(x2))
    y2_ref = _reference(x2, True, mod_conv2.weight, mod_conv2.bias)
    assert y2.shape == (1, C2, 2 * H2, 2 * W2)
    np.testing.assert_allclose(np.asarray(y2.astype(jnp.float32)),
                               np.asarray(y2_ref), rtol=3e-2, atol=3e-2)

    # ---- no-conv path (exact nearest upsample) ------------------------------
    mod_plain = Upsample(channels=C, use_conv=False)
    y3 = jax.block_until_ready(jax.jit(mod_plain.__call__)(x))
    y3_ref = _reference(x, False)
    assert y3.shape == (N, C, 2 * H, 2 * W)
    np.testing.assert_allclose(np.asarray(y3), np.asarray(y3_ref),
                               rtol=1e-6, atol=1e-6)

    print("KERNEL_OK")
</pallas_src>

<mosaic_0001>
module attributes {stable_mosaic.version = 11 : i64} {
  func.func @_upsample_conv_kernel(%arg0: i32, %arg1: i32, %arg2: i32, %arg3: memref<1x16x16x4xbf16, #tpu.memory_space<vmem>>, %arg4: memref<2x24x8xbf16, #tpu.memory_space<vmem>>, %arg5: memref<1x8xf32, #tpu.memory_space<vmem>>, %arg6: memref<1x16x2x16x8xbf16, #tpu.memory_space<vmem>>) attributes {dimension_semantics = [#tpu.dimension_semantics<parallel>, #tpu.dimension_semantics<parallel>, #tpu.dimension_semantics<arbitrary>], iteration_bounds = array<i64: 2, 1, 1>, scalar_prefetch = 0 : i64, scratch_operands = 0 : i64, tpu.core_type = #tpu.core_type<tc>, window_params = [{transform_indices = @transform_0, window_bounds = array<i64: 1, 16, 16, 4>}, {pipeline_mode = #tpu.pipeline_mode<synchronous>, transform_indices = @transform_1, window_bounds = array<i64: 2, 24, 8>}, {pipeline_mode = #tpu.pipeline_mode<synchronous>, transform_indices = @transform_2, window_bounds = array<i64: 1, 8>}, {transform_indices = @transform_3, window_bounds = array<i64: 1, 16, 2, 16, 8>}]} {
    %c16_i32 = arith.constant 16 : i32
    %0 = arith.muli %arg1, %c16_i32 : i32
    %1 = tpu.assume_multiple %0, 16 : i32
    %c0 = arith.constant 0 : index
    %2 = arith.index_cast %1 : i32 to index
    %c0_0 = arith.constant 0 : index
    %c0_1 = arith.constant 0 : index
    %3 = vector.load %arg3[%c0, %2, %c0_0, %c0_1] : memref<1x16x16x4xbf16, #tpu.memory_space<vmem>>, vector<1x16x16x4xbf16>
    %4 = vector.shape_cast %3 : vector<1x16x16x4xbf16> to vector<16x16x4xbf16>
    %c1_i32 = arith.constant 1 : i32
    %5 = arith.subi %1, %c1_i32 : i32
    %c0_i32 = arith.constant 0 : i32
    %6 = arith.maxsi %5, %c0_i32 : i32
    %c0_2 = arith.constant 0 : index
    %7 = arith.index_cast %6 : i32 to index
    %c0_3 = arith.constant 0 : index
    %c0_4 = arith.constant 0 : index
    %8 = vector.load %arg3[%c0_2, %7, %c0_3, %c0_4] : memref<1x16x16x4xbf16, #tpu.memory_space<vmem>>, vector<1x1x16x4xbf16>
    %9 = vector.shape_cast %8 : vector<1x1x16x4xbf16> to vector<1x16x4xbf16>
    %c16_i32_5 = arith.constant 16 : i32
    %10 = arith.addi %1, %c16_i32_5 : i32
    %c15_i32 = arith.constant 15 : i32
    %11 = arith.minsi %10, %c15_i32 : i32
    %c0_6 = arith.constant 0 : index
    %12 = arith.index_cast %11 : i32 to index
    %c0_7 = arith.constant 0 : index
    %c0_8 = arith.constant 0 : index
    %13 = vector.load %arg3[%c0_6, %12, %c0_7, %c0_8] : memref<1x16x16x4xbf16, #tpu.memory_space<vmem>>, vector<1x1x16x4xbf16>
    %14 = vector.shape_cast %13 : vector<1x1x16x4xbf16> to vector<1x16x4xbf16>
    %c0_i32_9 = arith.constant 0 : i32
    %15 = arith.cmpi eq, %arg1, %c0_i32_9 : i32
    %cst = arith.constant 0.000000e+00 : bf16
    %16 = vector.broadcast %cst : bf16 to vector<1x16x4xbf16>
    %17 = arith.select %15, %16, %9 : vector<1x16x4xbf16>
    %c0_i32_10 = arith.constant 0 : i32
    %18 = arith.cmpi eq, %arg1, %c0_i32_10 : i32
    %cst_11 = arith.constant 0.000000e+00 : bf16
    %19 = vector.broadcast %cst_11 : bf16 to vector<1x16x4xbf16>
    %20 = arith.select %18, %19, %14 : vector<1x16x4xbf16>
    %21 = tpu.concatenate %17, %4, %20 in 0 : vector<1x16x4xbf16>, vector<16x16x4xbf16>, vector<1x16x4xbf16> -> vector<18x16x4xbf16>
    %cst_12 = arith.constant 0.000000e+00 : bf16
    %22 = vector.broadcast %cst_12 : bf16 to vector<18x1x4xbf16>
    %23 = tpu.concatenate %22, %21, %22 in 1 : vector<18x1x4xbf16>, vector<18x16x4xbf16>, vector<18x1x4xbf16> -> vector<18x18x4xbf16>
    %c0_13 = arith.constant 0 : index
    %c0_14 = arith.constant 0 : index
    %24 = vector.load %arg5[%c0_13, %c0_14] : memref<1x8xf32, #tpu.memory_space<vmem>>, vector<1x8xf32>
    %25 = vector.extract_strided_slice %23 {offsets = [0, 0, 0], sizes = [16, 16, 4], strides = [1, 1, 1]} : vector<18x18x4xbf16> to vector<16x16x4xbf16>
    %26 = vector.extract_strided_slice %23 {offsets = [0, 1, 0], sizes = [16, 16, 4], strides = [1, 1, 1]} : vector<18x18x4xbf16> to vector<16x16x4xbf16>
    %27 = vector.extract_strided_slice %23 {offsets = [0, 2, 0], sizes = [16, 16, 4], strides = [1, 1, 1]} : vector<18x18x4xbf16> to vector<16x16x4xbf16>
    %28 = vector.extract_strided_slice %23 {offsets = [1, 0, 0], sizes = [16, 16, 4], strides = [1, 1, 1]} : vector<18x18x4xbf16> to vector<16x16x4xbf16>
    %29 = vector.extract_strided_slice %23 {offsets = [1, 1, 0], sizes = [16, 16, 4], strides = [1, 1, 1]} : vector<18x18x4xbf16> to vector<16x16x4xbf16>
    %30 = vector.extract_strided_slice %23 {offsets = [1, 2, 0], sizes = [16, 16, 4], strides = [1, 1, 1]} : vector<18x18x4xbf16> to vector<16x16x4xbf16>
    %31 = tpu.concatenate %25, %26, %27, %28, %29, %30 in 2 : vector<16x16x4xbf16>, vector<16x16x4xbf16>, vector<16x16x4xbf16>, vector<16x16x4xbf16>, vector<16x16x4xbf16>, vector<16x16x4xbf16> -> vector<16x16x24xbf16>
    %32 = vector.shape_cast %31 : vector<16x16x24xbf16> to vector<256x24xbf16>
    %c0_15 = arith.constant 0 : index
    %c0_16 = arith.constant 0 : index
    %c0_17 = arith.constant 0 : index
    %33 = vector.load %arg4[%c0_15, %c0_16, %c0_17] : memref<2x24x8xbf16, #tpu.memory_space<vmem>>, vector<1x24x8xbf16>
    %34 = vector.shape_cast %33 : vector<1x24x8xbf16> to vector<24x8xbf16>
    %cst_18 = arith.constant dense<0.000000e+00> : vector<256x8xf32>
    %35 = tpu.matmul %32, %34, %cst_18 {dimension_numbers = #tpu.dot_dimension_numbers<[1], [0], [0], [1], [0, 0, 1, 1], [], []>} : vector<256x24xbf16>, vector<24x8xbf16>, vector<256x8xf32> -> vector<256x8xf32>
    %36 = vector.broadcast %24 : vector<1x8xf32> to vector<256x8xf32>
    %37 = arith.addf %35, %36 : vector<256x8xf32>
    %38 = vector.shape_cast %37 : vector<256x8xf32> to vector<16x16x8xf32>
    %39 = arith.truncf %38 : vector<16x16x8xf32> to vector<16x16x8xbf16>
    %c0_19 = arith.constant 0 : index
    %c0_20 = arith.constant 0 : index
    %c0_21 = arith.constant 0 : index
    %c0_22 = arith.constant 0 : index
    %c0_23 = arith.constant 0 : index
    %40 = vector.load %arg6[%c0_19, %c0_20, %c0_21, %c0_22, %c0_23] : memref<1x16x2x16x8xbf16, #tpu.memory_space<vmem>>, vector<1x16x1x16x8xbf16>
    %41 = vector.shape_cast %40 : vector<1x16x1x16x8xbf16> to vector<16x16x8xbf16>
    %42 = vector.shape_cast %39 : vector<16x16x8xbf16> to vector<1x16x1x16x8xbf16>
    tpu.vector_store %arg6[%c0_19, %c0_20, %c0_21, %c0_22, %c0_23], %42 {strides = array<i32>} : memref<1x16x2x16x8xbf16, #tpu.memory_space<vmem>>, vector<1x16x1x16x8xbf16>,
    %43 = vector.extract_strided_slice %23 {offsets = [1, 0, 0], sizes = [16, 16, 4], strides = [1, 1, 1]} : vector<18x18x4xbf16> to vector<16x16x4xbf16>
    %44 = vector.extract_strided_slice %23 {offsets = [1, 1, 0], sizes = [16, 16, 4], strides = [1, 1, 1]} : vector<18x18x4xbf16> to vector<16x16x4xbf16>
    %45 = vector.extract_strided_slice %23 {offsets = [1, 2, 0], sizes = [16, 16, 4], strides = [1, 1, 1]} : vector<18x18x4xbf16> to vector<16x16x4xbf16>
    %46 = vector.extract_strided_slice %23 {offsets = [2, 0, 0], sizes = [16, 16, 4], strides = [1, 1, 1]} : vector<18x18x4xbf16> to vector<16x16x4xbf16>
    %47 = vector.extract_strided_slice %23 {offsets = [2, 1, 0], sizes = [16, 16, 4], strides = [1, 1, 1]} : vector<18x18x4xbf16> to vector<16x16x4xbf16>
    %48 = vector.extract_strided_slice %23 {offsets = [2, 2, 0], sizes = [16, 16, 4], strides = [1, 1, 1]} : vector<18x18x4xbf16> to vector<16x16x4xbf16>
    %49 = tpu.concatenate %43, %44, %45, %46, %47, %48 in 2 : vector<16x16x4xbf16>, vector<16x16x4xbf16>, vector<16x16x4xbf16>, vector<16x16x4xbf16>, vector<16x16x4xbf16>, vector<16x16x4xbf16> -> vector<16x16x24xbf16>
    %50 = vector.shape_cast %49 : vector<16x16x24xbf16> to vector<256x24xbf16>
    %c1 = arith.constant 1 : index
    %c0_24 = arith.constant 0 : index
    %c0_25 = arith.constant 0 : index
    %51 = vector.load %arg4[%c1, %c0_24, %c0_25] : memref<2x24x8xbf16, #tpu.memory_space<vmem>>, vector<1x24x8xbf16>
    %52 = vector.shape_cast %51 : vector<1x24x8xbf16> to vector<24x8xbf16>
    %cst_26 = arith.constant dense<0.000000e+00> : vector<256x8xf32>
    %53 = tpu.matmul %50, %52, %cst_26 {dimension_numbers = #tpu.dot_dimension_numbers<[1], [0], [0], [1], [0, 0, 1, 1], [], []>} : vector<256x24xbf16>, vector<24x8xbf16>, vector<256x8xf32> -> vector<256x8xf32>
    %54 = vector.broadcast %24 : vector<1x8xf32> to vector<256x8xf32>
    %55 = arith.addf %53, %54 : vector<256x8xf32>
    %56 = vector.shape_cast %55 : vector<256x8xf32> to vector<16x16x8xf32>
    %57 = arith.truncf %56 : vector<16x16x8xf32> to vector<16x16x8xbf16>
    %c0_27 = arith.constant 0 : index
    %c0_28 = arith.constant 0 : index
    %c1_29 = arith.constant 1 : index
    %c0_30 = arith.constant 0 : index
    %c0_31 = arith.constant 0 : index
    %58 = vector.load %arg6[%c0_27, %c0_28, %c1_29, %c0_30, %c0_31] : memref<1x16x2x16x8xbf16, #tpu.memory_space<vmem>>, vector<1x16x1x16x8xbf16>
    %59 = vector.shape_cast %58 : vector<1x16x1x16x8xbf16> to vector<16x16x8xbf16>
    %60 = vector.shape_cast %57 : vector<16x16x8xbf16> to vector<1x16x1x16x8xbf16>
    tpu.vector_store %arg6[%c0_27, %c0_28, %c1_29, %c0_30, %c0_31], %60 {strides = array<i32>} : memref<1x16x2x16x8xbf16, #tpu.memory_space<vmem>>, vector<1x16x1x16x8xbf16>,
    return
  }
  func.func @transform_0(%arg0: i32, %arg1: i32, %arg2: i32) -> (i32, i32, i32, i32) {
    %c0_i32 = arith.constant 0 : i32
    %c0_i32_0 = arith.constant 0 : i32
    %c0_i32_1 = arith.constant 0 : i32
    %c0_i32_2 = arith.constant 0 : i32
    return %arg0, %c0_i32, %c0_i32_0, %c0_i32_1 : i32, i32, i32, i32
  }
  func.func @transform_1(%arg0: i32, %arg1: i32, %arg2: i32) -> (i32, i32, i32) {
    %c0_i32 = arith.constant 0 : i32
    %c0_i32_0 = arith.constant 0 : i32
    %c0_i32_1 = arith.constant 0 : i32
    %c0_i32_2 = arith.constant 0 : i32
    return %c0_i32, %c0_i32_0, %c0_i32_1 : i32, i32, i32
  }
  func.func @transform_2(%arg0: i32, %arg1: i32, %arg2: i32) -> (i32, i32) {
    %c0_i32 = arith.constant 0 : i32
    %c0_i32_0 = arith.constant 0 : i32
    %c0_i32_1 = arith.constant 0 : i32
    return %c0_i32, %c0_i32_0 : i32, i32
  }
  func.func @transform_3(%arg0: i32, %arg1: i32, %arg2: i32) -> (i32, i32, i32, i32, i32) {
    %c0_i32 = arith.constant 0 : i32
    %c0_i32_0 = arith.constant 0 : i32
    %c0_i32_1 = arith.constant 0 : i32
    %c0_i32_2 = arith.constant 0 : i32
    return %arg0, %arg1, %c0_i32, %c0_i32_0, %c0_i32_1 : i32, i32, i32, i32, i32
  }
}

</mosaic_0001>

<bundles_post_ra>
// kernel: a_call__.1
= control target key start
LH: loop header
LB: loop body
LE: loop exit
PB: predicated region body
PF: predicated region fallthrough
CT: control target
= control target key end

     0   :  { %s2462_s12 = smov 0   ;;  %s2464_s13 = smov 0   ;;  %s3175_s0 = inlined_call_operand.vmem [shape: bf16[2,16,16,4], index: 0, kind: input, shape index: {}]   ;;  %s3176_s1 = inlined_call_operand.vmem [shape: bf16[2,24,8], index: 1, kind: input, shape index: {}]   ;;  %s3177_s2 = inlined_call_operand.vmem [shape: f32[1,8], index: 2, kind: input, shape index: {}]   ;;  %s3178_s3 = inlined_call_operand.vmem [shape: bf16[2,16,2,16,8], index: 3, kind: output, shape index: {}]  }
   0x1   :  { %s2466_s14 = smov 0  }
   0x2 LB: > { %s32_s15 = sadd.s32 1, %s2430_s13  ;;  %p2023_p0 = scmp.ge.s32.totalorder %s2434_s14, 1  ;;  %s2434_s14 = sphi %s2466_s14, %s13_s14   ;;  %s2430_s13 = sphi %s2464_s13, %s3182_s13   ;;  %s2426_s12 = sphi %s2462_s12, %s3181_s12  }
   0x3   : > { %p34_p1 = scmp.ge.s32.totalorder %s32_s15, 2  ;;  %p158_p2 = scmp.lt.s32.totalorder %s2434_s14, 3 }
   0x5   : > { %s3184_s15 = smov (%p34_p1, %s32_s15), 0  ;;  %p159_p3 = pnand %p2023_p0, %p158_p2 }
   0x6   : > { %v2436_v0 = vmov (!%p159_p3), 0   ;;  %vm516_vm0 = vcmask (!%p159_p3), 1040384   ;;  %vm517_vm1 = vsmask.f32 (!%p159_p3), 256  ;;  %p187_p4 = scmp.lt.s32.totalorder (!%p159_p3), %s2426_s12, 1  ;;  %vm813_vm3 = vcmask (!%p159_p3), 1046528  }
   0x7   : > { %162 = sbr.rel (%p159_p3) target bundleno = 529 (0x211), region = 32  ;;  %v2030_v1 = vcombine.low (!%p159_p3), %v2436_v0, %v2436_v0  ;;  %vm2482_vm2 = vmand (!%p159_p3), %vm516_vm0, %vm517_vm1  ;;  %s2437_s20 = smov (!%p159_p3), 8   ;;  %vm556_vm4 = vsmask.f32 (!%p159_p3), 7424  ;;  %vm1223_vm5 = vcmask (!%p159_p3), 1043456   ;;  %vm1007_vm6 = vcmask (!%p159_p3), 31744  }
   0x8   : > { %s2438_s21 = smov (!%p159_p3), 12   ;;  %s2439_s22 = smov (!%p159_p3), 4   ;;  %vm1040_vm7 = vcmask (!%p159_p3), 64512   ;;  %vm1073_vm8 = vcmask (!%p159_p3), 97280   ;;  %vm1106_vm9 = vcmask (!%p159_p3), 130048   ;;  %vm1139_vm10 = vcmask (!%p159_p3), 162816  }
   0x9   : > { %v355_v2 = vshrl.u32 (!%p159_p3), %v2030_v1, 16  ;;  %v358_v3 = vshll.u32 (!%p159_p3), %v2030_v1, 16  ;;  %s2440_s25 = smov (!%p159_p3), 16   ;;  %s2441_s28 = smov (!%p159_p3), 20   ;;  %vm1190_vm11 = vcmask (!%p159_p3), 195584   ;;  %vm1516_vm12 = vcmask (!%p159_p3), 60416  }
   0xb   : > { %v357_v5 = vrot.slane (!%p159_p3), %v355_v2, 7 }
   0xd   : > { %v360_v6 = vor.u32 (!%p159_p3), %v358_v3, %v357_v5  ;;  %v537_v7 = vsel (!%p159_p3), %vm2482_vm2, %v357_v5, 0 }
   0xe   : > { %s3186_s12 = smov (!%p187_p4, %s2426_s12), 1  ;;  %v815_v9 = vrot.slane %v537_v7, 1  ;;  %v565_v24 = vshll.u32 %v537_v7, 16 }
   0xf   : > { %s2186_s16 = sshll.u32 %s3186_s12, 7  ;;  %v2498_v11 = vsel %vm2482_vm2, 0, %v360_v6  ;;  %s2187_s8 = sshll.u32 %s3186_s12, 8 }
  0x10   : > { %s2490_s19 = scalar_lea.vmem %s3175_s0, %s2186_s16  ;;  %v814_v15 = vrot.slane %v2498_v11, 1  ;;  %v560_v21 = vshll.u32 %v2498_v11, 16  ;;  %v558_v27 = vshrl.u32 %v2498_v11, 16  ;;  %v567_v36 = vrot.slane %v565_v24, 1  ;;  %s2973_s11 = scalar_lea.vmem %s3178_s3, %s2187_s8 }
  0x11   : > { %v2392_v8 = vld [vmem:[%s2490_s19] sm:$0xff]   ;;  %v2393_v10 = vld [vmem:[%s2490_s19 + $0x8] sm:$0xff]   ;;  %v2394_v14 = vld [vmem:[%s2490_s19 + $0x10] sm:$0xff]  }
  0x12   : > { %v362_v12 = vshrl.u32 %v2392_v8, 16  ;;  %v365_v13 = vshll.u32 %v2392_v8, 16  ;;  %v369_v16 = vshrl.u32 %v2393_v10, 16  ;;  %v372_v17 = vshll.u32 %v2393_v10, 16  ;;  %v2395_v42 = vld [vmem:[%s2490_s19 + $0x18] sm:$0xff]   ;;  %v2396_v8 = vld [vmem:[%s2490_s19 + $0x20] sm:$0xff]  }
  0x13   : > { %v376_v19 = vshrl.u32 %v2394_v14, 16  ;;  %v379_v20 = vshll.u32 %v2394_v14, 16  ;;  %v2504_v22 = vsel %vm813_vm3, %v814_v15, %v815_v9  ;;  %v562_v28 = vrot.slane %v560_v21, 1  ;;  %v2406_v9 = vld [vmem:[%s3176_s1] sm:$0xff]   ;;  %v2407_v10 = vld [vmem:[%s3176_s1 + $0xc] sm:$0xff]  }
  0x14   : > { %v364_v18 = vrot.slane %v362_v12, 7  ;;  %v371_v23 = vrot.slane %v369_v16, 7  ;;  %862 = vrot.lane.b32.xlu1 %v2504_v22, %s2437_s20  ;;  %v383_v58 = vshrl.u32 %v2395_v42, 16  ;;  %v386_v0 = vshll.u32 %v2395_v42, 16  ;;  %2288 = vmatprep.subr.bf16.mxu0 %v2406_v9 }
  0x15   : > { %v378_v26 = vrot.slane %v376_v19, 7  ;;  %v563_v40 = vor.u32 %v562_v28, %v558_v27  ;;  %v390_v14 = vshrl.u32 %v2396_v8, 16  ;;  %2289 = vmatpush3.bf16.msra.mxu0 %v2406_v9  ;;  %2324 = vmatprep.subr.bf16.mxu1 %v2407_v10  ;;  %v393_v16 = vshll.u32 %v2396_v8, 16 }
  0x16   : > { %v367_v25 = vor.u32 %v365_v13, %v364_v18  ;;  %v374_v29 = vor.u32 %v372_v17, %v371_v23  ;;  %v539_v30 = vsel %vm2482_vm2, %v371_v23, 0  ;;  %v538_v31 = vsel %vm2482_vm2, %v364_v18, 0  ;;  %2325 = vmatpush3.bf16.msra.mxu1 %v2407_v10  ;;  %v2397_v17 = vld [vmem:[%s2490_s19 + $0x28] sm:$0xff]  }
  0x17   : > { %v381_v33 = vor.u32 %v379_v20, %v378_v26  ;;  %v821_v34 = vrot.slane %v539_v30, 1  ;;  %v589_v37 = vshll.u32 %v539_v30, 16  ;;  %v818_v41 = vrot.slane %v538_v31, 1 }
  0x18   : > { %v2515_v32 = vsel %vm2482_vm2, 0, %v367_v25  ;;  %v2521_v35 = vsel %vm2482_vm2, 0, %v374_v29  ;;  %v577_v49 = vshll.u32 %v538_v31, 16  ;;  %v540_v50 = vsel %vm2482_vm2, %v378_v26, 0 }
  0x19   : > { %895 = vrot.lane.b32.xlu0 %v2515_v32, %s2438_s21  ;;  %897 = vrot.lane.b32.xlu1 %v2521_v35, %s2438_s21  ;;  %v2527_v38 = vsel %vm2482_vm2, 0, %v381_v33  ;;  %v820_v39 = vrot.slane %v2521_v35, 1  ;;  %v582_v43 = vshrl.u32 %v2521_v35, 16  ;;  %v584_v44 = vshll.u32 %v2521_v35, 16 }
  0x1a   : > { %v570_v45 = vshrl.u32 %v2515_v32, 16  ;;  %v572_v46 = vshll.u32 %v2515_v32, 16  ;;  %v817_v48 = vrot.slane %v2515_v32, 1  ;;  %v591_v52 = vrot.slane %v589_v37, 1 }
  0x1b   : > { %v822_v47 = vsel %vm813_vm3, %v820_v39, %v821_v34  ;;  %v586_v51 = vrot.slane %v584_v44, 1  ;;  %v596_v54 = vshll.u32 %v2527_v38, 16  ;;  %v2544_v55 = vsel %vm556_vm4, %v563_v40, %v567_v36 }
  0x1c   : > { %v574_v53 = vrot.slane %v572_v46, 1  ;;  %v594_v56 = vshrl.u32 %v2527_v38, 16  ;;  %v601_v57 = vshll.u32 %v540_v50, 16  ;;  %v579_v61 = vrot.slane %v577_v49, 1 }
  0x1d   : > { %899 = vrot.lane.b32.xlu0 %v2527_v38, %s2438_s21  ;;  %866 = vrot.lane.b32.xlu1 %v822_v47, %s2437_s20  ;;  %v587_v59 = vor.u32 %v586_v51, %v582_v43  ;;  %v598_v62 = vrot.slane %v596_v54, 1  ;;  %v385_v63 = vrot.slane %v383_v58, 7  ;;  %v819_v2 = vsel %vm813_vm3, %v817_v48, %v818_v41  ;;  %v2398_v43 = vld [vmem:[%s2490_s19 + $0x30] sm:$0xff]  }
  0x1e   : > { %v575_v60 = vor.u32 %v574_v53, %v570_v45  ;;  %v603_v6 = vrot.slane %v601_v57, 1  ;;  %v392_v19 = vrot.slane %v390_v14, 7  ;;  %v823_v20 = vrot.slane %v2527_v38, 1  ;;  %v2399_v57 = vld [vmem:[%s2490_s19 + $0x38] sm:$0xff]  }
  0x1f   : > { %v592_v1 = vsel %vm556_vm4, %v587_v59, %v591_v52  ;;  %v599_v5 = vor.u32 %v598_v62, %v594_v56  ;;  %v388_v7 = vor.u32 %v386_v0, %v385_v63  ;;  %v541_v18 = vsel %vm2482_vm2, %v385_v63, 0 }
  0x20   : > { %v580_v3 = vsel %vm556_vm4, %v575_v60, %v579_v61  ;;  %v824_v21 = vrot.slane %v540_v50, 1  ;;  %v613_v25 = vshll.u32 %v541_v18, 16  ;;  %v395_v26 = vor.u32 %v393_v16, %v392_v19 }
  0x21   : > { %749 = vrot.lane.b32.xlu0 %v2544_v55, %s2439_s22  ;;  %753 = vrot.lane.b32.xlu1 %v592_v1, %s2439_s22  ;;  %v604_v12 = vsel %vm556_vm4, %v599_v5, %v603_v6  ;;  %v2565_v13 = vsel %vm2482_vm2, 0, %v388_v7  ;;  %v397_v27 = vshrl.u32 %v2397_v17, 16  ;;  %v400_v34 = vshll.u32 %v2397_v17, 16  ;;  %v2409_v7 = vld [vmem:[%s3176_s1 + $0x14] ss:$0 sps:$4 sm:$0xff]  }
  0x22   : > { %v608_v15 = vshll.u32 %v2565_v13, 16  ;;  %v606_v23 = vshrl.u32 %v2565_v13, 16  ;;  %v825_v28 = vsel %vm813_vm3, %v823_v20, %v824_v21  ;;  %v615_v30 = vrot.slane %v613_v25, 1  ;;  %2361 = vmatprep.subr.msk.bf16.mxu1 %vm1223_vm5, %v2409_v7  ;;  %v2400_v20 = vld [vmem:[%s2490_s19 + $0x40] sm:$0xff]  }
  0x23   : > { %v2582_v31 = vsel %vm2482_vm2, 0, %v395_v26  ;;  %v399_v33 = vrot.slane %v397_v27, 7  ;;  %v826_v37 = vrot.slane %v2565_v13, 1  ;;  %v827_v39 = vrot.slane %v541_v18, 1 }
  0x24   : > { %v610_v24 = vrot.slane %v608_v15, 1  ;;  %v620_v40 = vshll.u32 %v2582_v31, 16  ;;  %v542_v41 = vsel %vm2482_vm2, %v392_v19, 0  ;;  %v618_v45 = vshrl.u32 %v2582_v31, 16 }
  0x25   : > { %864 = vrot.lane.b32.xlu0 %v819_v2, %s2437_s20  ;;  %939 = vrot.lane.b32.xlu1 %v580_v3, %s2440_s25  ;;  %v402_v42 = vor.u32 %v400_v34, %v399_v33  ;;  %v828_v44 = vsel %vm813_vm3, %v826_v37, %v827_v39  ;;  %v404_v49 = vshrl.u32 %v2398_v43, 16  ;;  %v543_v53 = vsel %vm2482_vm2, %v399_v33, 0  ;;  %v2401_v39 = vld [vmem:[%s2490_s19 + $0x48] sm:$0xff]  }
  0x26   : > { %v611_v29 = vor.u32 %v610_v24, %v606_v23  ;;  %v622_v46 = vrot.slane %v620_v40, 1  ;;  %v407_v56 = vshll.u32 %v2398_v43, 16  ;;  %v829_v58 = vrot.slane %v2582_v31, 1 }
  0x27   : > { %v2599_v48 = vsel %vm2482_vm2, 0, %v402_v42  ;;  %v406_v54 = vrot.slane %v404_v49, 7  ;;  %v830_v59 = vrot.slane %v542_v41, 1  ;;  %v637_v63 = vshll.u32 %v543_v53, 16 }
  0x28   : > { %v616_v36 = vsel %vm556_vm4, %v611_v29, %v615_v30  ;;  %v623_v50 = vor.u32 %v622_v46, %v618_v45  ;;  %v632_v52 = vshll.u32 %v2599_v48, 16  ;;  %v630_v61 = vshrl.u32 %v2599_v48, 16 }
  0x29   : > { %751 = vrot.lane.b32.xlu0 %v580_v3, %s2439_s22  ;;  %943 = vrot.lane.b32.xlu1 %v604_v12, %s2440_s25  ;;  %v409_v0 = vor.u32 %v407_v56, %v406_v54  ;;  %v831_v3 = vsel %vm813_vm3, %v829_v58, %v830_v59  ;;  %v639_v6 = vrot.slane %v637_v63, 1  ;;  %v414_v10 = vshll.u32 %v2399_v57, 16 }
  0x2a   : > { %v634_v62 = vrot.slane %v632_v52, 1  ;;  %v833_v15 = vrot.slane %v543_v53, 1  ;;  %v544_v18 = vsel %vm2482_vm2, %v406_v54, 0  ;;  %v1602_v21 = vsel %vm1223_vm5, %v2409_v7, 0 }
  0x2b   : > { %v2624_v8 = vsel %vm2482_vm2, 0, %v409_v0  ;;  %v649_v26 = vshll.u32 %v544_v18, 16  ;;  %2327 = vmatpush3.bf16.msra.mxu1 %v1602_v21  ;;  %v421_v37 = vshll.u32 %v2400_v20, 16  ;;  %v836_v40 = vrot.slane %v544_v18, 1 }
  0x2c   : > { %v635_v5 = vor.u32 %v634_v62, %v630_v61  ;;  %v644_v16 = vshll.u32 %v2624_v8, 16  ;;  %v642_v24 = vshrl.u32 %v2624_v8, 16  ;;  %v835_v43 = vrot.slane %v2624_v8, 1  ;;  %v2402_v62 = vld [vmem:[%s2490_s19 + $0x50] sm:$0xff]  }
  0x2d   : > { %941 = vrot.lane.b32.xlu0 %v592_v1, %s2440_s25  ;;  %977 = vrot.lane.b32.xlu1 %v822_v47, %s2441_s28  ;;  %v625_v47 = vshll.u32 %v542_v41, 16  ;;  %v411_v1 = vshrl.u32 %v2399_v57, 16  ;;  %v651_v30 = vrot.slane %v649_v26, 1  ;;  %v428_v54 = vshll.u32 %v2401_v39, 16 }
  0x2e   : > { %v640_v14 = vsel %vm556_vm4, %v635_v5, %v639_v6  ;;  %v646_v25 = vrot.slane %v644_v16, 1  ;;  %v837_v49 = vsel %vm813_vm3, %v835_v43, %v836_v40  ;;  %v432_v5 = vshrl.u32 %v2402_v62, 16 }
  0x2f   : > { %v627_v51 = vrot.slane %v625_v47, 1  ;;  %v413_v9 = vrot.slane %v411_v1, 7  ;;  %v425_v47 = vshrl.u32 %v2401_v39, 16 }
  0x30   : > { %v647_v29 = vor.u32 %v646_v25, %v642_v24 }
  0x31   : > { %975 = vrot.lane.b32.xlu0 %v819_v2, %s2441_s28  ;;  %755 = vrot.lane.b32.xlu1 %v604_v12, %s2439_s22  ;;  %v628_v60 = vsel %vm556_vm4, %v623_v50, %v627_v51  ;;  %v2408_v2 = vld [vmem:[%s3176_s1 + $0x8] ss:$0 sps:$4 sm:$0xff]   ;;  %v832_v12 = vrot.slane %v2599_v48, 1  ;;  %v416_v19 = vor.u32 %v414_v10, %v413_v9  ;;  %v545_v33 = vsel %vm2482_vm2, %v413_v9, 0 }
  0x32   : > { %2360 = vmatprep.subr.msk.bf16.mxu0 %vm1223_vm5, %v2408_v2  ;;  %v1225_v17 = vsel %vm1223_vm5, %v2408_v2, 0  ;;  %v661_v41 = vshll.u32 %v545_v33, 16  ;;  %v652_v42 = vsel %vm556_vm4, %v647_v29, %v651_v30  ;;  %v427_v53 = vrot.slane %v425_v47, 7 }
  0x33   : > { %2291 = vmatpush3.bf16.msra.mxu0 %v1225_v17  ;;  %v834_v23 = vsel %vm813_vm3, %v832_v12, %v833_v15  ;;  %v2641_v27 = vsel %vm2482_vm2, 0, %v416_v19  ;;  %v839_v58 = vrot.slane %v545_v33, 1  ;;  %v434_v12 = vrot.slane %v432_v5, 7  ;;  %v2403_v15 = vld [vmem:[%s2490_s19 + $0x58] sm:$0xff]  }
  0x34   : > { %v656_v34 = vshll.u32 %v2641_v27, 16  ;;  %v663_v51 = vrot.slane %v661_v41, 1  ;;  %v838_v57 = vrot.slane %v2641_v27, 1  ;;  %v430_v61 = vor.u32 %v428_v54, %v427_v53 }
  0x35   : > { %979 = vrot.lane.b32.xlu0 %v825_v28, %s2441_s28  ;;  %868 = vrot.lane.b32.xlu1 %v825_v28, %s2437_s20  ;;  %v418_v28 = vshrl.u32 %v2400_v20, 16  ;;  %v547_v10 = vsel %vm2482_vm2, %v427_v53, 0  ;;  %v439_v24 = vshrl.u32 %v2403_v15, 16  ;;  %v442_v33 = vshll.u32 %v2403_v15, 16 }
  0x36   : > { %v658_v45 = vrot.slane %v656_v34, 1  ;;  %v840_v63 = vsel %vm813_vm3, %v838_v57, %v839_v58  ;;  %v685_v21 = vshll.u32 %v547_v10, 16  ;;  %v548_v40 = vsel %vm2482_vm2, %v434_v12, 0  ;;  %v2405_v58 = vld [vmem:[%s2490_s19 + $0x68] sm:$0xff]  }
  0x37   : > { %v441_v30 = vrot.slane %v439_v24, 7 }
  0x39   : > { %757 = vrot.lane.b32.xlu0 %v616_v36, %s2439_s22  ;;  %901 = vrot.lane.b32.xlu1 %v2565_v13, %s2438_s21  ;;  %v444_v41 = vor.u32 %v442_v33, %v441_v30  ;;  %v549_v54 = vsel %vm2482_vm2, %v441_v30, 0 }
  0x3b   : > { %v2713_v47 = vsel %vm2482_vm2, 0, %v444_v41 }
  0x3c   : > { %v704_v53 = vshll.u32 %v2713_v47, 16  ;;  %v850_v15 = vrot.slane %v2713_v47, 1 }
  0x3d   : > { %870 = vrot.lane.b32.xlu0 %v828_v44, %s2437_s20  ;;  %945 = vrot.lane.b32.xlu1 %v616_v36, %s2440_s25  ;;  %v420_v36 = vrot.slane %v418_v28, 7  ;;  %v687_v28 = vrot.slane %v685_v21, 1 }
  0x3f   : > { %v423_v46 = vor.u32 %v421_v37, %v420_v36  ;;  %v845_v37 = vrot.slane %v547_v10, 1 }
  0x41   : > { %903 = vrot.lane.b32.xlu0 %v2582_v31, %s2438_s21  ;;  %981 = vrot.lane.b32.xlu1 %v828_v44, %s2441_s28  ;;  %v654_v44 = vshrl.u32 %v2641_v27, 16  ;;  %v2660_v52 = vsel %vm2482_vm2, 0, %v423_v46  ;;  %v697_v46 = vshll.u32 %v548_v40, 16 }
  0x42   : > { %v668_v59 = vshll.u32 %v2660_v52, 16  ;;  %v666_v0 = vshrl.u32 %v2660_v52, 16  ;;  %v841_v16 = vrot.slane %v2660_v52, 1 }
  0x43   : > { %v659_v50 = vor.u32 %v658_v45, %v654_v44 }
  0x44   : > { %v670_v1 = vrot.slane %v668_v59, 1 }
  0x45   : > { %947 = vrot.lane.b32.xlu0 %v628_v60, %s2440_s25  ;;  %759 = vrot.lane.b32.xlu1 %v628_v60, %s2439_s22  ;;  %v664_v56 = vsel %vm556_vm4, %v659_v50, %v663_v51  ;;  %v546_v60 = vsel %vm2482_vm2, %v420_v36, 0  ;;  %v699_v51 = vrot.slane %v697_v46, 1 }
  0x46   : > { %v673_v2 = vshll.u32 %v546_v60, 16  ;;  %v671_v6 = vor.u32 %v670_v1, %v666_v0  ;;  %v842_v17 = vrot.slane %v546_v60, 1  ;;  %v848_v60 = vrot.slane %v548_v40, 1 }
  0x47   : > { %v709_v0 = vshll.u32 %v549_v54, 16 }
  0x48   : > { %v675_v7 = vrot.slane %v673_v2, 1  ;;  %v843_v25 = vsel %vm813_vm3, %v841_v16, %v842_v17  ;;  %v453_v2 = vshrl.u32 %v2405_v58, 16  ;;  %v851_v16 = vrot.slane %v549_v54, 1 }
  0x49   : > { %983 = vrot.lane.b32.xlu0 %v831_v3, %s2441_s28  ;;  %872 = vrot.lane.b32.xlu1 %v831_v3, %s2437_s20  ;;  %v2677_v3 = vsel %vm2482_vm2, 0, %v430_v61 }
  0x4a   : > { %v680_v9 = vshll.u32 %v2677_v3, 16  ;;  %v676_v18 = vsel %vm556_vm4, %v671_v6, %v675_v7  ;;  %v678_v19 = vshrl.u32 %v2677_v3, 16  ;;  %v844_v36 = vrot.slane %v2677_v3, 1 }
  0x4b   : > { %v711_v7 = vrot.slane %v709_v0, 1  ;;  %v455_v10 = vrot.slane %v453_v2, 7 }
  0x4c   : > { %v682_v20 = vrot.slane %v680_v9, 1  ;;  %v846_v43 = vsel %vm813_vm3, %v844_v36, %v845_v37  ;;  %v2411_v36 = vld [vmem:[%s2490_s19 + $0x78] sm:$0xff]  }
  0x4d   : > { %761 = vrot.lane.b32.xlu0 %v640_v14, %s2439_s22  ;;  %905 = vrot.lane.b32.xlu1 %v2599_v48, %s2438_s21  ;;  %v467_v46 = vshrl.u32 %v2411_v36, 16 }
  0x4e   : > { %v683_v26 = vor.u32 %v682_v20, %v678_v19  ;;  %v2410_v20 = vld [vmem:[%s2490_s19 + $0x70] sm:$0xff]  }
  0x4f   : > { %v460_v33 = vshrl.u32 %v2410_v20, 16 }
  0x50   : > { %v688_v34 = vsel %vm556_vm4, %v683_v26, %v687_v28 }
  0x51   : > { %874 = vrot.lane.b32.xlu0 %v834_v23, %s2437_s20  ;;  %949 = vrot.lane.b32.xlu1 %v640_v14, %s2440_s25  ;;  %v435_v14 = vshll.u32 %v2402_v62, 16  ;;  %v702_v62 = vshrl.u32 %v2713_v47, 16 }
  0x55   : > { %907 = vrot.lane.b32.xlu0 %v2624_v8, %s2438_s21  ;;  %985 = vrot.lane.b32.xlu1 %v834_v23, %s2441_s28  ;;  %v437_v23 = vor.u32 %v435_v14, %v434_v12  ;;  %v456_v12 = vshll.u32 %v2405_v58, 16 }
  0x57   : > { %v2696_v29 = vsel %vm2482_vm2, 0, %v437_v23  ;;  %v458_v19 = vor.u32 %v456_v12, %v455_v10  ;;  %v852_v23 = vsel %vm813_vm3, %v850_v15, %v851_v16 }
  0x58   : > { %v692_v39 = vshll.u32 %v2696_v29, 16  ;;  %v690_v44 = vshrl.u32 %v2696_v29, 16  ;;  %v847_v59 = vrot.slane %v2696_v29, 1 }
  0x59   : > { %951 = vrot.lane.b32.xlu0 %v652_v42, %s2440_s25  ;;  %763 = vrot.lane.b32.xlu1 %v652_v42, %s2439_s22  ;;  %v2404_v42 = vld [vmem:[%s2490_s19 + $0x60] sm:$0xff]   ;;  %v2753_v30 = vsel %vm2482_vm2, 0, %v458_v19 }
  0x5a   : > { %v694_v45 = vrot.slane %v692_v39, 1  ;;  %v449_v57 = vshll.u32 %v2404_v42, 16  ;;  %v849_v5 = vsel %vm813_vm3, %v847_v59, %v848_v60  ;;  %v728_v40 = vshll.u32 %v2753_v30, 16 }
  0x5b   : > { %v469_v60 = vrot.slane %v467_v46, 7 }
  0x5c   : > { %v695_v50 = vor.u32 %v694_v45, %v690_v44  ;;  %v463_v44 = vshll.u32 %v2410_v20, 16  ;;  %v730_v54 = vrot.slane %v728_v40, 1 }
  0x5d   : > { %987 = vrot.lane.b32.xlu0 %v837_v49, %s2441_s28  ;;  %876 = vrot.lane.b32.xlu1 %v837_v49, %s2437_s20  ;;  %v446_v49 = vshrl.u32 %v2404_v42, 16  ;;  %v551_v42 = vsel %vm2482_vm2, %v455_v10, 0 }
  0x5e   : > { %v700_v61 = vsel %vm556_vm4, %v695_v50, %v699_v51  ;;  %v857_v10 = vrot.slane %v551_v42, 1 }
  0x61   : > { %765 = vrot.lane.b32.xlu0 %v664_v56, %s2439_s22  ;;  %909 = vrot.lane.b32.xlu1 %v2641_v27, %s2438_s21 }
  0x65   : > { %878 = vrot.lane.b32.xlu0 %v840_v63, %s2437_s20  ;;  %953 = vrot.lane.b32.xlu1 %v664_v56, %s2440_s25  ;;  %v448_v56 = vrot.slane %v446_v49, 7 }
  0x67   : > { %v451_v1 = vor.u32 %v449_v57, %v448_v56 }
  0x69   : > { %911 = vrot.lane.b32.xlu0 %v2660_v52, %s2438_s21  ;;  %989 = vrot.lane.b32.xlu1 %v840_v63, %s2441_s28  ;;  %v706_v63 = vrot.slane %v704_v53, 1  ;;  %v2732_v9 = vsel %vm2482_vm2, 0, %v451_v1  ;;  %v726_v53 = vshrl.u32 %v2753_v30, 16 }
  0x6a   : > { %v716_v17 = vshll.u32 %v2732_v9, 16  ;;  %v714_v24 = vshrl.u32 %v2732_v9, 16  ;;  %v853_v49 = vrot.slane %v2732_v9, 1 }
  0x6b   : > { %v707_v6 = vor.u32 %v706_v63, %v702_v62  ;;  %v731_v63 = vor.u32 %v730_v54, %v726_v53 }
  0x6d   : > { %955 = vrot.lane.b32.xlu0 %v676_v18, %s2440_s25  ;;  %767 = vrot.lane.b32.xlu1 %v676_v18, %s2439_s22  ;;  %v712_v14 = vsel %vm556_vm4, %v707_v6, %v711_v7  ;;  %v550_v18 = vsel %vm2482_vm2, %v448_v56, 0  ;;  %v733_v56 = vshll.u32 %v551_v42, 16  ;;  %v856_v7 = vrot.slane %v2753_v30, 1 }
  0x6e   : > { %v721_v26 = vshll.u32 %v550_v18, 16  ;;  %v854_v50 = vrot.slane %v550_v18, 1 }
  0x6f   : > { %v735_v0 = vrot.slane %v733_v56, 1 }
  0x70   : > { %v723_v39 = vrot.slane %v721_v26, 1  ;;  %v855_v62 = vsel %vm813_vm3, %v853_v49, %v854_v50 }
  0x71   : > { %991 = vrot.lane.b32.xlu0 %v843_v25, %s2441_s28  ;;  %880 = vrot.lane.b32.xlu1 %v843_v25, %s2437_s20  ;;  %v718_v25 = vrot.slane %v716_v17, 1  ;;  %v736_v12 = vsel %vm556_vm4, %v731_v63, %v735_v0 }
  0x73   : > { %v719_v37 = vor.u32 %v718_v25, %v714_v24  ;;  %v858_v24 = vsel %vm813_vm3, %v856_v7, %v857_v10 }
  0x75   : > { %769 = vrot.lane.b32.xlu0 %v688_v34, %s2439_s22  ;;  %913 = vrot.lane.b32.xlu1 %v2677_v3, %s2438_s21  ;;  %v724_v51 = vsel %vm556_vm4, %v719_v37, %v723_v39  ;;  %v553_v39 = vsel %vm2482_vm2, %v469_v60, 0 }
  0x76   : > { %v935_v49 = vshll.u32 %v553_v39, 16  ;;  %v973_v10 = vrot.slane %v553_v39, 1 }
  0x78   : > { %v937_v63 = vrot.slane %v935_v49, 1 }
  0x79   : > { %882 = vrot.lane.b32.xlu0 %v846_v43, %s2437_s20  ;;  %957 = vrot.lane.b32.xlu1 %v688_v34, %s2440_s25 }
  0x7d   : > { %915 = vrot.lane.b32.xlu0 %v2696_v29, %s2438_s21  ;;  %993 = vrot.lane.b32.xlu1 %v846_v43, %s2441_s28  ;;  %v462_v43 = vrot.slane %v460_v33, 7 }
  0x7f   : > { %v465_v58 = vor.u32 %v463_v44, %v462_v43  ;;  %v552_v16 = vsel %vm2482_vm2, %v462_v43, 0 }
  0x80   : > { %v745_v33 = vshll.u32 %v552_v16, 16 }
  0x81   : > { %959 = vrot.lane.b32.xlu0 %v700_v61, %s2440_s25  ;;  %771 = vrot.lane.b32.xlu1 %v700_v61, %s2439_s22  ;;  %v470_v61 = vshll.u32 %v2411_v36, 16  ;;  %v2776_v2 = vsel %vm2482_vm2, 0, %v465_v58 }
  0x82   : > { %v747_v46 = vrot.slane %v745_v33, 1  ;;  %v859_v58 = vrot.slane %v2776_v2, 1 }
  0x83   : > { %v472_v6 = vor.u32 %v470_v61, %v469_v60 }
  0x85   : > { %995 = vrot.lane.b32.xlu0 %v849_v5, %s2441_s28  ;;  %884 = vrot.lane.b32.xlu1 %v849_v5, %s2437_s20  ;;  %v2791_v20 = vsel %vm2482_vm2, 0, %v472_v6 }
  0x86   : > { %v2742_v21 = vpop.permute.xlu1 %862  ;;  %v930_v40 = vshll.u32 %v2791_v20, 16  ;;  %v928_v53 = vshrl.u32 %v2791_v20, 16  ;;  %v972_v7 = vrot.slane %v2791_v20, 1 }
  0x88   : > { %v932_v54 = vrot.slane %v930_v40, 1 }
  0x89   : > { %773 = vrot.lane.b32.xlu0 %v712_v14, %s2439_s22  ;;  %917 = vrot.lane.b32.xlu1 %v2713_v47, %s2438_s21 }
  0x8b   : > { %v2749_v28 = vpop.permute.xlu0 %895  ;;  %v898_v34 = vpop.permute.xlu1 %897 }
  0x8d   : > { %886 = vrot.lane.b32.xlu0 %v852_v23, %s2437_s20  ;;  %961 = vrot.lane.b32.xlu1 %v712_v14, %s2440_s25  ;;  %v740_v14 = vshll.u32 %v2776_v2, 16 }
  0x8f   : > { %v2759_v41 = vpop.permute.xlu0 %899  ;;  %v2763_v45 = vpop.permute.xlu1 %866  ;;  %v742_v26 = vrot.slane %v740_v14, 1 }
  0x91   : > { %919 = vrot.lane.b32.xlu0 %v2732_v9, %s2438_s21  ;;  %997 = vrot.lane.b32.xlu1 %v852_v23, %s2441_s28 }
  0x93   : > { %v750_v57 = vpop.permute.xlu0 %749  ;;  %v754_v59 = vpop.permute.xlu1 %753 }
  0x94   : > { %v1009_v17 = vsel %vm1007_vm6, %v2498_v11, %v750_v57  ;;  %v1013_v42 = vsel %vm1007_vm6, %v2521_v35, %v754_v59  ;;  %v860_v59 = vrot.slane %v552_v16, 1  ;;  %v974_v16 = vsel %vm813_vm3, %v972_v7, %v973_v10 }
  0x95   : > { %963 = vrot.lane.b32.xlu0 %v724_v51, %s2440_s25  ;;  %775 = vrot.lane.b32.xlu1 %v724_v51, %s2439_s22  ;;  %v1042_v36 = vsel %vm1040_vm7, %v1009_v17, %v2742_v21  ;;  %v1046_v35 = vsel %vm1040_vm7, %v1013_v42, %v2763_v45 }
  0x96   : > { %v1075_v21 = vsel %vm1073_vm8, %v1042_v36, %v2749_v28  ;;  %v1079_v28 = vsel %vm1073_vm8, %v1046_v35, %v2759_v41  ;;  %v861_v41 = vsel %vm813_vm3, %v859_v58, %v860_v59 }
  0x97   : > { %v865_v1 = vpop.permute.xlu0 %864  ;;  %v940_v5 = vpop.permute.xlu1 %939 }
  0x98   : > { %v1108_v50 = vsel %vm1106_vm9, %v1075_v21, %v940_v5 }
  0x99   : > { %999 = vrot.lane.b32.xlu0 %v855_v62, %s2441_s28  ;;  %888 = vrot.lane.b32.xlu1 %v855_v62, %s2437_s20  ;;  %v933_v62 = vor.u32 %v932_v54, %v928_v53 }
  0x9b   : > { %v752_v15 = vpop.permute.xlu0 %751  ;;  %v944_v19 = vpop.permute.xlu1 %943  ;;  %v938_v6 = vsel %vm556_vm4, %v933_v62, %v937_v63 }
  0x9c   : > { %v1011_v18 = vsel %vm1007_vm6, %v2515_v32, %v752_v15  ;;  %v738_v32 = vshrl.u32 %v2776_v2, 16  ;;  %v1112_v60 = vsel %vm1106_vm9, %v1079_v28, %v944_v19 }
  0x9d   : > { %v1044_v23 = vsel %vm1040_vm7, %v1011_v18, %v865_v1  ;;  %777 = vrot.lane.b32.xlu0 %v736_v12, %s2439_s22  ;;  %921 = vrot.lane.b32.xlu1 %v2753_v30, %s2438_s21 }
  0x9e   : > { %v1077_v25 = vsel %vm1073_vm8, %v1044_v23, %v898_v34  ;;  %v743_v4 = vor.u32 %v742_v26, %v738_v32 }
  0x9f   : > { %v942_v37 = vpop.permute.xlu0 %941  ;;  %v978_v34 = vpop.permute.xlu1 %977 }
  0xa0   : > { %v1110_v43 = vsel %vm1106_vm9, %v1077_v25, %v942_v37  ;;  %v748_v45 = vsel %vm556_vm4, %v743_v4, %v747_v46 }
  0xa1   : > { %890 = vrot.lane.b32.xlu0 %v858_v24, %s2437_s20  ;;  %v1143_v44 = vsel %vm1139_vm10, %v1110_v43, %v978_v34  ;;  %965 = vrot.lane.b32.xlu1 %v736_v12, %s2440_s25 }
  0xa2   : > { %2328 = vmatprep.mubr.msk.bf16.mxu1 %vm1190_vm11, %v1143_v44 }
  0xa3   : > { %v976_v51 = vpop.permute.xlu0 %975  ;;  %v756_v56 = vpop.permute.xlu1 %755 }
  0xa4   : > { %v1141_v57 = vsel %vm1139_vm10, %v1108_v50, %v976_v51  ;;  %v1015_v14 = vsel %vm1007_vm6, %v2527_v38, %v756_v56 }
  0xa5   : > { %923 = vrot.lane.b32.xlu0 %v2776_v2, %s2438_s21  ;;  %2292 = vmatprep.mubr.msk.bf16.mxu0 %vm1190_vm11, %v1141_v57 }
  0xa6   : > { %1001 = vrot.lane.b32.xlu1 %v858_v24, %s2441_s28  ;;  %2293 = vmatmul.mubr.msk.bf16.vlgmr.msra.gmra.mrb[0].mxu0 %vm1190_vm11, %v1143_v44 }
  0xa7   : > { %v980_v61 = vpop.permute.xlu0 %979  ;;  %v869_v1 = vpop.permute.xlu1 %868 }
  0xa8   : > { %v1145_v0 = vsel %vm1139_vm10, %v1112_v60, %v980_v61  ;;  %v1048_v17 = vsel %vm1040_vm7, %v1015_v14, %v869_v1 }
  0xa9   : > { %967 = vrot.lane.b32.xlu0 %v748_v45, %s2440_s25  ;;  %2296 = vmatprep.mubr.msk.bf16.mxu0 %vm1190_vm11, %v1145_v0 }
  0xaa   : > { %2329 = vmatmul.mubr.msk.bf16.vlgmr.msra.gmra.mrb[0].mxu1 %vm1190_vm11, %v1145_v0  ;;  %779 = vrot.lane.b32.xlu1 %v748_v45, %s2439_s22 }
  0xab   : > { %v758_v5 = vpop.permute.xlu0 %757  ;;  %v902_v12 = vpop.permute.xlu1 %901 }
  0xac   : > { %v1081_v19 = vsel %vm1073_vm8, %v1048_v17, %v902_v12  ;;  %v1017_v26 = vsel %vm1007_vm6, %v2565_v13, %v758_v5 }
  0xad   : > { %1003 = vrot.lane.b32.xlu0 %v861_v41, %s2441_s28 }
  0xae   : > { %1549 = vrot.lane.b32.xlu1 %v938_v6, %s2439_s22 }
  0xaf   : > { %v871_v15 = vpop.permute.xlu0 %870  ;;  %v946_v18 = vpop.permute.xlu1 %945 }
  0xb0   : > { %v1114_v24 = vsel %vm1106_vm9, %v1081_v19, %v946_v18  ;;  %v1050_v36 = vsel %vm1040_vm7, %v1017_v26, %v871_v15 }
  0xb1   : > { %892 = vrot.lane.b32.xlu0 %v861_v41, %s2437_s20 }
  0xb2   : > { %1551 = vrot.lane.b32.xlu1 %v974_v16, %s2437_s20 }
  0xb3   : > { %v904_v23 = vpop.permute.xlu0 %903  ;;  %v982_v38 = vpop.permute.xlu1 %981 }
  0xb4   : > { %v1147_v25 = vsel %vm1139_vm10, %v1114_v24, %v982_v38  ;;  %v1083_v37 = vsel %vm1073_vm8, %v1050_v36, %v904_v23 }
  0xb5   : > { %925 = vrot.lane.b32.xlu0 %v2791_v20, %s2438_s21  ;;  %2297 = vmatmul.mubr.msk.bf16.gmra.mrb[4].mxu0 %vm1190_vm11, %v1147_v25 }
  0xb6   : > { %1554 = vrot.lane.b32.xlu1 %v2498_v11, %s2438_s21  ;;  %2332 = vmatprep.mubr.msk.bf16.mxu1 %vm1190_vm11, %v1147_v25 }
  0xb7   : > { %v948_v32 = vpop.permute.xlu0 %947  ;;  %v760_v33 = vpop.permute.xlu1 %759 }
  0xb8   : > { %v1116_v11 = vsel %vm1106_vm9, %v1083_v37, %v948_v32  ;;  %v1019_v34 = vsel %vm1007_vm6, %v2582_v31, %v760_v33 }
  0xb9   : > { %969 = vrot.lane.b32.xlu0 %v938_v6, %s2440_s25 }
  0xba   : > { %1568 = vrot.lane.b32.xlu1 %v2544_v55, %s2440_s25 }
  0xbb   : > { %v984_v39 = vpop.permute.xlu0 %983  ;;  %v873_v42 = vpop.permute.xlu1 %872 }
  0xbc   : > { %v1149_v40 = vsel %vm1139_vm10, %v1116_v11, %v984_v39  ;;  %v1052_v44 = vsel %vm1040_vm7, %v1019_v34, %v873_v42 }
  0xbd   : > { %1005 = vrot.lane.b32.xlu0 %v974_v16, %s2441_s28  ;;  %2300 = vmatprep.mubr.msk.bf16.mxu0 %vm1190_vm11, %v1149_v40 }
  0xbe   : > { %2333 = vmatmul.mubr.msk.bf16.gmra.mrb[4].mxu1 %vm1190_vm11, %v1149_v40 }
  0xbf   : > { %v762_v13 = vpop.permute.xlu0 %761  ;;  %v906_v43 = vpop.permute.xlu1 %905 }
  0xc0   : > { %v1085_v4 = vsel %vm1073_vm8, %v1052_v44, %v906_v43 }
  0xc1   : > { %1574 = vrot.lane.b32.xlu0 %v2504_v22, %s2441_s28  ;;  %v1021_v22 = vsel %vm1007_vm6, %v2599_v48, %v762_v13 }
  0xc3   : > { %v875_v55 = vpop.permute.xlu0 %874  ;;  %v950_v21 = vpop.permute.xlu1 %949 }
  0xc4   : > { %v1118_v49 = vsel %vm1106_vm9, %v1085_v4, %v950_v21  ;;  %v1054_v53 = vsel %vm1040_vm7, %v1021_v22, %v875_v55 }
  0xc7   : > { %v908_v46 = vpop.permute.xlu0 %907  ;;  %v986_v35 = vpop.permute.xlu1 %985 }
  0xc8   : > { %v1151_v50 = vsel %vm1139_vm10, %v1118_v49, %v986_v35  ;;  %v1087_v54 = vsel %vm1073_vm8, %v1054_v53, %v908_v46 }
  0xc9   : > { %2301 = vmatmul.mubr.msk.bf16.gmra.mrb[8].mxu0 %vm1190_vm11, %v1151_v50  ;;  %2336 = vmatprep.mubr.msk.bf16.mxu1 %vm1190_vm11, %v1151_v50 }
  0xcb   : > { %v952_v31 = vpop.permute.xlu0 %951  ;;  %v764_v51 = vpop.permute.xlu1 %763 }
  0xcc   : > { %v1120_v56 = vsel %vm1106_vm9, %v1087_v54, %v952_v31  ;;  %v1023_v48 = vsel %vm1007_vm6, %v2624_v8, %v764_v51 }
  0xcf   : > { %v988_v57 = vpop.permute.xlu0 %987  ;;  %v877_v45 = vpop.permute.xlu1 %876 }
  0xd0   : > { %v1153_v28 = vsel %vm1139_vm10, %v1120_v56, %v988_v57  ;;  %v1056_v61 = vsel %vm1040_vm7, %v1023_v48, %v877_v45 }
  0xd1   : > { %2304 = vmatprep.mubr.msk.bf16.mxu0 %vm1190_vm11, %v1153_v28  ;;  %2337 = vmatmul.mubr.msk.bf16.gmra.mrb[8].mxu1 %vm1190_vm11, %v1153_v28 }
  0xd3   : > { %v766_v58 = vpop.permute.xlu0 %765  ;;  %v910_v59 = vpop.permute.xlu1 %909 }
  0xd4   : > { %v1089_v63 = vsel %vm1073_vm8, %v1056_v61, %v910_v59  ;;  %v1025_v8 = vsel %vm1007_vm6, %v2641_v27, %v766_v58 }
  0xd7   : > { %v879_v60 = vpop.permute.xlu0 %878  ;;  %v954_v62 = vpop.permute.xlu1 %953 }
  0xd8   : > { %v1122_v1 = vsel %vm1106_vm9, %v1089_v63, %v954_v62  ;;  %v1058_v10 = vsel %vm1040_vm7, %v1025_v8, %v879_v60 }
  0xdb   : > { %v912_v0 = vpop.permute.xlu0 %911  ;;  %v990_v41 = vpop.permute.xlu1 %989 }
  0xdc   : > { %v1155_v5 = vsel %vm1139_vm10, %v1122_v1, %v990_v41  ;;  %v1091_v12 = vsel %vm1073_vm8, %v1058_v10, %v912_v0 }
  0xdd   : > { %2305 = vmatmul.mubr.msk.bf16.gmra.mrb[12].mxu0 %vm1190_vm11, %v1155_v5  ;;  %2340 = vmatprep.mubr.msk.bf16.mxu1 %vm1190_vm11, %v1155_v5 }
  0xdf   : > { %v956_v6 = vpop.permute.xlu0 %955  ;;  %v768_v7 = vpop.permute.xlu1 %767 }
  0xe0   : > { %v1124_v14 = vsel %vm1106_vm9, %v1091_v12, %v956_v6  ;;  %v1027_v27 = vsel %vm1007_vm6, %v2660_v52, %v768_v7 }
  0xe3   : > { %v992_v15 = vpop.permute.xlu0 %991  ;;  %v881_v17 = vpop.permute.xlu1 %880 }
  0xe4   : > { %v1157_v16 = vsel %vm1139_vm10, %v1124_v14, %v992_v15  ;;  %v1060_v24 = vsel %vm1040_vm7, %v1027_v27, %v881_v17 }
  0xe5   : > { %2308 = vmatprep.mubr.msk.bf16.mxu0 %vm1190_vm11, %v1157_v16  ;;  %2341 = vmatmul.mubr.msk.bf16.gmra.mrb[12].mxu1 %vm1190_vm11, %v1157_v16 }
  0xe7   : > { %v770_v18 = vpop.permute.xlu0 %769  ;;  %v914_v19 = vpop.permute.xlu1 %913 }
  0xe8   : > { %v1093_v25 = vsel %vm1073_vm8, %v1060_v24, %v914_v19  ;;  %v1029_v52 = vsel %vm1007_vm6, %v2677_v3, %v770_v18 }
  0xeb   : > { %v883_v23 = vpop.permute.xlu0 %882  ;;  %v958_v38 = vpop.permute.xlu1 %957 }
  0xec   : > { %v1126_v26 = vsel %vm1106_vm9, %v1093_v25, %v958_v38  ;;  %v1062_v39 = vsel %vm1040_vm7, %v1029_v52, %v883_v23 }
  0xef   : > { %v916_v32 = vpop.permute.xlu0 %915  ;;  %v994_v33 = vpop.permute.xlu1 %993 }
  0xf0   : > { %v1159_v36 = vsel %vm1139_vm10, %v1126_v26, %v994_v33  ;;  %v1095_v40 = vsel %vm1073_vm8, %v1062_v39, %v916_v32  ;;  %v2966_v39 = vld [vmem:[%s3177_s2] ss:$0 sm:$0xff] }
  0xf1   : > { %2309 = vmatmul.mubr.msk.bf16.gmra.mrb[16].mxu0 %vm1190_vm11, %v1159_v36  ;;  %2344 = vmatprep.mubr.msk.bf16.mxu1 %vm1190_vm11, %v1159_v36 }
  0xf3   : > { %v960_v37 = vpop.permute.xlu0 %959  ;;  %v772_v11 = vpop.permute.xlu1 %771 }
  0xf4   : > { %v1128_v42 = vsel %vm1106_vm9, %v1095_v40, %v960_v37  ;;  %v1031_v3 = vsel %vm1007_vm6, %v2696_v29, %v772_v11 }
  0xf7   : > { %v996_v13 = vpop.permute.xlu0 %995  ;;  %v885_v34 = vpop.permute.xlu1 %884 }
  0xf8   : > { %v1161_v43 = vsel %vm1139_vm10, %v1128_v42, %v996_v13  ;;  %v1064_v4 = vsel %vm1040_vm7, %v1031_v3, %v885_v34 }
  0xf9   : > { %2312 = vmatprep.mubr.msk.bf16.mxu0 %vm1190_vm11, %v1161_v43  ;;  %2345 = vmatmul.mubr.msk.bf16.gmra.mrb[16].mxu1 %vm1190_vm11, %v1161_v43 }
  0xfb   : > { %v774_v55 = vpop.permute.xlu0 %773  ;;  %v918_v44 = vpop.permute.xlu1 %917 }
  0xfc   : > { %v1097_v49 = vsel %vm1073_vm8, %v1064_v4, %v918_v44  ;;  %v1033_v29 = vsel %vm1007_vm6, %v2713_v47, %v774_v55 }
  0xff   : > { %v887_v21 = vpop.permute.xlu0 %886  ;;  %v962_v46 = vpop.permute.xlu1 %961 }
 0x100   : > { %v1130_v50 = vsel %vm1106_vm9, %v1097_v49, %v962_v46  ;;  %v1066_v54 = vsel %vm1040_vm7, %v1033_v29, %v887_v21 }
 0x103   : > { %v920_v35 = vpop.permute.xlu0 %919  ;;  %v998_v31 = vpop.permute.xlu1 %997 }
 0x104   : > { %v1163_v22 = vsel %vm1139_vm10, %v1130_v50, %v998_v31  ;;  %v1099_v56 = vsel %vm1073_vm8, %v1066_v54, %v920_v35 }
 0x105   : > { %2313 = vmatmul.mubr.msk.bf16.gmra.mrb[20].mxu0 %vm1190_vm11, %v1163_v22  ;;  %2348 = vmatprep.mubr.msk.bf16.mxu1 %vm1190_vm11, %v1163_v22 }
 0x107   : > { %v964_v51 = vpop.permute.xlu0 %963  ;;  %v776_v53 = vpop.permute.xlu1 %775 }
 0x108   : > { %v1132_v57 = vsel %vm1106_vm9, %v1099_v56, %v964_v51  ;;  %v1035_v47 = vsel %vm1007_vm6, %v2732_v9, %v776_v53 }
 0x10b   : > { %v1000_v28 = vpop.permute.xlu0 %999  ;;  %v889_v58 = vpop.permute.xlu1 %888 }
 0x10c   : > { %v1165_v45 = vsel %vm1139_vm10, %v1132_v57, %v1000_v28  ;;  %v1068_v61 = vsel %vm1040_vm7, %v1035_v47, %v889_v58 }
 0x10d   : > { %2316 = vmatprep.mubr.msk.bf16.mxu0 %vm1190_vm11, %v1165_v45  ;;  %2349 = vmatmul.mubr.msk.bf16.gmra.mrb[20].mxu1 %vm1190_vm11, %v1165_v45 }
 0x10f   : > { %v778_v59 = vpop.permute.xlu0 %777  ;;  %v922_v48 = vpop.permute.xlu1 %921 }
 0x110   : > { %v1101_v63 = vsel %vm1073_vm8, %v1068_v61, %v922_v48  ;;  %v1037_v9 = vsel %vm1007_vm6, %v2753_v30, %v778_v59 }
 0x113   : > { %v891_v60 = vpop.permute.xlu0 %890  ;;  %v966_v62 = vpop.permute.xlu1 %965 }
 0x114   : > { %v1134_v1 = vsel %vm1106_vm9, %v1101_v63, %v966_v62  ;;  %v1070_v7 = vsel %vm1040_vm7, %v1037_v9, %v891_v60 }
 0x117   : > { %v924_v0 = vpop.permute.xlu0 %923 }
 0x118   : > { %v1002_v41 = vpop.permute.xlu1 %1001  ;;  %v1103_v10 = vsel %vm1073_vm8, %v1070_v7, %v924_v0 }
 0x119   : > { %v1167_v5 = vsel %vm1139_vm10, %v1134_v1, %v1002_v41 }
 0x11a   : > { %2317 = vmatmul.mubr.msk.bf16.gmra.mrb[24].mxu0 %vm1190_vm11, %v1167_v5  ;;  %2352 = vmatprep.mubr.msk.bf16.mxu1 %vm1190_vm11, %v1167_v5 }
 0x11b   : > { %v968_v6 = vpop.permute.xlu0 %967 }
 0x11c   : > { %v780_v8 = vpop.permute.xlu1 %779  ;;  %v1136_v12 = vsel %vm1106_vm9, %v1103_v10, %v968_v6 }
 0x11d   : > { %v1039_v30 = vsel %vm1007_vm6, %v2776_v2, %v780_v8 }
 0x11f   : > { %v1004_v14 = vpop.permute.xlu0 %1003 }
 0x120   : > { %v1169_v15 = vsel %vm1139_vm10, %v1136_v12, %v1004_v14  ;;  %v1550_v16 = vpop.permute.xlu1 %1549 }
 0x121   : > { %2320 = vmatprep.mubr.msk.bf16.mxu0 %vm1190_vm11, %v1169_v15  ;;  %2353 = vmatmul.mubr.msk.bf16.gmra.mrb[24].mxu1 %vm1190_vm11, %v1169_v15  ;;  %v1577_v24 = vsel %vm1007_vm6, %v2791_v20, %v1550_v16 }
 0x123   : > { %v893_v17 = vpop.permute.xlu0 %892 }
 0x124   : > { %v1552_v18 = vpop.permute.xlu1 %1551  ;;  %v1072_v38 = vsel %vm1040_vm7, %v1039_v30, %v893_v17 }
 0x125   : > { %v1579_v32 = vsel %vm1040_vm7, %v1577_v24, %v1552_v18 }
 0x127   : > { %v926_v19 = vpop.permute.xlu0 %925 }
 0x128   : > { %v1555_v27 = vpop.permute.xlu1 %1554  ;;  %v1105_v25 = vsel %vm1073_vm8, %v1072_v38, %v926_v19 }
 0x129   : > { %v1581_v2 = vsel %vm1073_vm8, %v1579_v32, %v1555_v27 }
 0x12b   : > { %v970_v23 = vpop.permute.xlu0 %969 }
 0x12c   : > { %v1138_v26 = vsel %vm1106_vm9, %v1105_v25, %v970_v23  ;;  %v1569_v36 = vpop.permute.xlu1 %1568 }
 0x12d   : > { %v1583_v20 = vsel %vm1106_vm9, %v1581_v2, %v1569_v36 }
 0x12f   : > { %v1006_v33 = vpop.permute.xlu0 %1005 }
 0x130   : > { %v1171_v37 = vsel %vm1139_vm10, %v1138_v26, %v1006_v33 }
 0x131   : > { %2321 = vmatmul.mubr.msk.bf16.gmra.mrb[28].mxu0 %vm1190_vm11, %v1171_v37  ;;  %2356 = vmatprep.mubr.msk.bf16.mxu1 %vm1190_vm11, %v1171_v37 }
 0x133   : > { %v1575_v52 = vpop.permute.xlu0 %1574 }
 0x134   : > { %v1585_v11 = vsel %vm1139_vm10, %v1583_v20, %v1575_v52 }
 0x135   : > { %2357 = vmatmul.mubr.msk.bf16.gmra.mrb[28].mxu1 %vm1190_vm11, %v1585_v11 }
 0x179   : > { %v2294_v40 = vpop.f32.mrb[0].mxu0 }
 0x17a   : > { %v1270_v42 = vadd.f32 %v2294_v40, %v2966_v39  ;;  %v1261_v13 = vpop.f32.mrb[1].mxu0 }
 0x17b   : > { %v1262_v43 = vadd.f32 %v2966_v39, %v1261_v13  ;;  %v2295_v34 = vpop.f32.mrb[2].mxu0 }
 0x17c   : > { %v2190_v55 = vpack.c.bf16 %v1270_v42, %v1270_v42  ;;  %v1273_v44 = vadd.f32 %v2295_v34, %v2966_v39  ;;  %v1264_v3 = vpop.f32.mrb[3].mxu0 }
 0x17d   : > { %v2188_v21 = vpack.c.bf16 %v1262_v43, %v1262_v43  ;;  %v1265_v4 = vadd.f32 %v2966_v39, %v1264_v3  ;;  %v2330_v46 = vpop.f32.mrb[0].mxu1 }
 0x17e   : > { %1519 = vst.msk [vmem:[%s2973_s11 + $0x10] sm:$0xf] %vm1516_vm12, %v2190_v55  ;;  %v2191_v49 = vpack.c.bf16 %v1273_v44, %v1273_v44  ;;  %v1647_v35 = vadd.f32 %v2330_v46, %v2966_v39  ;;  %v1638_v50 = vpop.f32.mrb[1].mxu1 }
 0x17f   : > { %1517 = vst.msk [vmem:[%s2973_s11] sm:$0xf] %vm1516_vm12, %v2188_v21  ;;  %v2189_v31 = vpack.c.bf16 %v1265_v4, %v1265_v4  ;;  %v1639_v22 = vadd.f32 %v2966_v39, %v1638_v50  ;;  %v2331_v51 = vpop.f32.mrb[2].mxu1 }
 0x180   : > { %1520 = vst.msk [vmem:[%s2973_s11 + $0x14] sm:$0xf] %vm1516_vm12, %v2191_v49  ;;  %v2222_v29 = vpack.c.bf16 %v1647_v35, %v1647_v35  ;;  %v1650_v53 = vadd.f32 %v2331_v51, %v2966_v39  ;;  %v1641_v54 = vpop.f32.mrb[3].mxu1 }
 0x181   : > { %1518 = vst.msk [vmem:[%s2973_s11 + $0x4] sm:$0xf] %vm1516_vm12, %v2189_v31  ;;  %v2220_v56 = vpack.c.bf16 %v1639_v22, %v1639_v22  ;;  %v1642_v57 = vadd.f32 %v2966_v39, %v1641_v54 }
 0x182   : > { %2154 = vst.msk [vmem:[%s2973_s11 + $0x18] sm:$0xf] %vm1516_vm12, %v2222_v29  ;;  %v2223_v28 = vpack.c.bf16 %v1650_v53, %v1650_v53 }
 0x183   : > { %2152 = vst.msk [vmem:[%s2973_s11 + $0x8] sm:$0xf] %vm1516_vm12, %v2220_v56  ;;  %v2221_v45 = vpack.c.bf16 %v1642_v57, %v1642_v57 }
 0x184   : > { %2155 = vst.msk [vmem:[%s2973_s11 + $0x1c] sm:$0xf] %vm1516_vm12, %v2223_v28 }
 0x185   : > { %2153 = vst.msk [vmem:[%s2973_s11 + $0xc] sm:$0xf] %vm1516_vm12, %v2221_v45 }
 0x188   : > { %v2298_v58 = vpop.f32.mrb[4].mxu0 }
 0x189   : > { %v1286_v59 = vadd.f32 %v2298_v58, %v2966_v39  ;;  %v1277_v48 = vpop.f32.mrb[5].mxu0 }
 0x18a   : > { %v1278_v47 = vadd.f32 %v2966_v39, %v1277_v48  ;;  %v2299_v60 = vpop.f32.mrb[6].mxu0 }
 0x18b   : > { %v2194_v61 = vpack.c.bf16 %v1286_v59, %v1286_v59  ;;  %v1289_v62 = vadd.f32 %v2299_v60, %v2966_v39  ;;  %v1280_v63 = vpop.f32.mrb[7].mxu0 }
 0x18c   : > { %v2192_v0 = vpack.c.bf16 %v1278_v47, %v1278_v47  ;;  %v1281_v1 = vadd.f32 %v2966_v39, %v1280_v63 }
 0x18d   : > { %1523 = vst.msk [vmem:[%s2973_s11 + $0x30] sm:$0xf] %vm1516_vm12, %v2194_v61  ;;  %v2195_v41 = vpack.c.bf16 %v1289_v62, %v1289_v62 }
 0x18e   : > { %1521 = vst.msk [vmem:[%s2973_s11 + $0x20] sm:$0xf] %vm1516_vm12, %v2192_v0  ;;  %v2193_v5 = vpack.c.bf16 %v1281_v1, %v1281_v1 }
 0x18f   : > { %1524 = vst.msk [vmem:[%s2973_s11 + $0x34] sm:$0xf] %vm1516_vm12, %v2195_v41 }
 0x190   : > { %1522 = vst.msk [vmem:[%s2973_s11 + $0x24] sm:$0xf] %vm1516_vm12, %v2193_v5 }
 0x191   : > { %v2334_v6 = vpop.f32.mrb[4].mxu1 }
 0x192   : > { %v1663_v9 = vadd.f32 %v2334_v6, %v2966_v39  ;;  %v1654_v8 = vpop.f32.mrb[5].mxu1 }
 0x193   : > { %v1655_v7 = vadd.f32 %v2966_v39, %v1654_v8  ;;  %v2335_v10 = vpop.f32.mrb[6].mxu1 }
 0x194   : > { %v2226_v12 = vpack.c.bf16 %v1663_v9, %v1663_v9  ;;  %v1666_v14 = vadd.f32 %v2335_v10, %v2966_v39  ;;  %v1657_v15 = vpop.f32.mrb[7].mxu1 }
 0x195   : > { %v2224_v16 = vpack.c.bf16 %v1655_v7, %v1655_v7  ;;  %v1658_v17 = vadd.f32 %v2966_v39, %v1657_v15 }
 0x196   : > { %2158 = vst.msk [vmem:[%s2973_s11 + $0x38] sm:$0xf] %vm1516_vm12, %v2226_v12  ;;  %v2227_v18 = vpack.c.bf16 %v1666_v14, %v1666_v14 }
 0x197   : > { %2156 = vst.msk [vmem:[%s2973_s11 + $0x28] sm:$0xf] %vm1516_vm12, %v2224_v16  ;;  %v2225_v19 = vpack.c.bf16 %v1658_v17, %v1658_v17 }
 0x198   : > { %2159 = vst.msk [vmem:[%s2973_s11 + $0x3c] sm:$0xf] %vm1516_vm12, %v2227_v18 }
 0x199   : > { %2157 = vst.msk [vmem:[%s2973_s11 + $0x2c] sm:$0xf] %vm1516_vm12, %v2225_v19 }
 0x19c   : > { %v2302_v30 = vpop.f32.mrb[8].mxu0 }
 0x19d   : > { %v1302_v27 = vadd.f32 %v2302_v30, %v2966_v39  ;;  %v1293_v23 = vpop.f32.mrb[9].mxu0 }
 0x19e   : > { %v1294_v24 = vadd.f32 %v2966_v39, %v1293_v23  ;;  %v2303_v38 = vpop.f32.mrb[10].mxu0 }
 0x19f   : > { %v2198_v25 = vpack.c.bf16 %v1302_v27, %v1302_v27  ;;  %v1305_v32 = vadd.f32 %v2303_v38, %v2966_v39  ;;  %v1296_v26 = vpop.f32.mrb[11].mxu0 }
 0x1a0   : > { %v2196_v33 = vpack.c.bf16 %v1294_v24, %v1294_v24  ;;  %v1297_v36 = vadd.f32 %v2966_v39, %v1296_v26 }
 0x1a1   : > { %1527 = vst.msk [vmem:[%s2973_s11 + $0x50] sm:$0xf] %vm1516_vm12, %v2198_v25  ;;  %v2199_v37 = vpack.c.bf16 %v1305_v32, %v1305_v32 }
 0x1a2   : > { %1525 = vst.msk [vmem:[%s2973_s11 + $0x40] sm:$0xf] %vm1516_vm12, %v2196_v33  ;;  %v2197_v2 = vpack.c.bf16 %v1297_v36, %v1297_v36 }
 0x1a3   : > { %1528 = vst.msk [vmem:[%s2973_s11 + $0x54] sm:$0xf] %vm1516_vm12, %v2199_v37 }
 0x1a4   : > { %v2338_v20 = vpop.f32.mrb[8].mxu1  ;;  %1526 = vst.msk [vmem:[%s2973_s11 + $0x44] sm:$0xf] %vm1516_vm12, %v2197_v2 }
 0x1a5   : > { %v1679_v52 = vadd.f32 %v2338_v20, %v2966_v39  ;;  %v1670_v11 = vpop.f32.mrb[9].mxu1 }
 0x1a6   : > { %v1671_v40 = vadd.f32 %v2966_v39, %v1670_v11  ;;  %v2339_v42 = vpop.f32.mrb[10].mxu1 }
 0x1a7   : > { %v2230_v13 = vpack.c.bf16 %v1679_v52, %v1679_v52  ;;  %v1682_v43 = vadd.f32 %v2339_v42, %v2966_v39  ;;  %v1673_v34 = vpop.f32.mrb[11].mxu1 }
 0x1a8   : > { %v2228_v55 = vpack.c.bf16 %v1671_v40, %v1671_v40  ;;  %v1674_v44 = vadd.f32 %v2966_v39, %v1673_v34 }
 0x1a9   : > { %2162 = vst.msk [vmem:[%s2973_s11 + $0x58] sm:$0xf] %vm1516_vm12, %v2230_v13  ;;  %v2231_v3 = vpack.c.bf16 %v1682_v43, %v1682_v43 }
 0x1aa   : > { %2160 = vst.msk [vmem:[%s2973_s11 + $0x48] sm:$0xf] %vm1516_vm12, %v2228_v55  ;;  %v2229_v21 = vpack.c.bf16 %v1674_v44, %v1674_v44 }
 0x1ab   : > { %2163 = vst.msk [vmem:[%s2973_s11 + $0x5c] sm:$0xf] %vm1516_vm12, %v2231_v3 }
 0x1ac   : > { %2161 = vst.msk [vmem:[%s2973_s11 + $0x4c] sm:$0xf] %vm1516_vm12, %v2229_v21 }
 0x1b0   : > { %v2306_v4 = vpop.f32.mrb[12].mxu0 }
 0x1b1   : > { %v1318_v46 = vadd.f32 %v2306_v4, %v2966_v39  ;;  %v1309_v49 = vpop.f32.mrb[13].mxu0 }
 0x1b2   : > { %v1310_v35 = vadd.f32 %v2966_v39, %v1309_v49  ;;  %v2307_v50 = vpop.f32.mrb[14].mxu0 }
 0x1b3   : > { %v2202_v31 = vpack.c.bf16 %v1318_v46, %v1318_v46  ;;  %v1321_v22 = vadd.f32 %v2307_v50, %v2966_v39  ;;  %v1312_v51 = vpop.f32.mrb[15].mxu0 }
 0x1b4   : > { %v2200_v29 = vpack.c.bf16 %v1310_v35, %v1310_v35  ;;  %v1313_v53 = vadd.f32 %v2966_v39, %v1312_v51 }
 0x1b5   : > { %1531 = vst.msk [vmem:[%s2973_s11 + $0x70] sm:$0xf] %vm1516_vm12, %v2202_v31  ;;  %v2203_v54 = vpack.c.bf16 %v1321_v22, %v1321_v22 }
 0x1b6   : > { %1529 = vst.msk [vmem:[%s2973_s11 + $0x60] sm:$0xf] %vm1516_vm12, %v2200_v29  ;;  %v2201_v56 = vpack.c.bf16 %v1313_v53, %v1313_v53 }
 0x1b7   : > { %1532 = vst.msk [vmem:[%s2973_s11 + $0x74] sm:$0xf] %vm1516_vm12, %v2203_v54 }
 0x1b8   : > { %v2342_v57 = vpop.f32.mrb[12].mxu1  ;;  %1530 = vst.msk [vmem:[%s2973_s11 + $0x64] sm:$0xf] %vm1516_vm12, %v2201_v56 }
 0x1b9   : > { %v1695_v28 = vadd.f32 %v2342_v57, %v2966_v39  ;;  %v1686_v45 = vpop.f32.mrb[13].mxu1 }
 0x1ba   : > { %v1687_v58 = vadd.f32 %v2966_v39, %v1686_v45  ;;  %v2343_v59 = vpop.f32.mrb[14].mxu1 }
 0x1bb   : > { %v2234_v48 = vpack.c.bf16 %v1695_v28, %v1695_v28  ;;  %v1698_v47 = vadd.f32 %v2343_v59, %v2966_v39  ;;  %v1689_v60 = vpop.f32.mrb[15].mxu1 }
 0x1bc   : > { %v2232_v61 = vpack.c.bf16 %v1687_v58, %v1687_v58  ;;  %v1690_v62 = vadd.f32 %v2966_v39, %v1689_v60 }
 0x1bd   : > { %2166 = vst.msk [vmem:[%s2973_s11 + $0x78] sm:$0xf] %vm1516_vm12, %v2234_v48  ;;  %v2235_v63 = vpack.c.bf16 %v1698_v47, %v1698_v47 }
 0x1be   : > { %2164 = vst.msk [vmem:[%s2973_s11 + $0x68] sm:$0xf] %vm1516_vm12, %v2232_v61  ;;  %v2233_v0 = vpack.c.bf16 %v1690_v62, %v1690_v62 }
 0x1bf   : > { %2167 = vst.msk [vmem:[%s2973_s11 + $0x7c] sm:$0xf] %vm1516_vm12, %v2235_v63 }
 0x1c0   : > { %2165 = vst.msk [vmem:[%s2973_s11 + $0x6c] sm:$0xf] %vm1516_vm12, %v2233_v0 }
 0x1c4   : > { %v2310_v1 = vpop.f32.mrb[16].mxu0 }
 0x1c5   : > { %v1334_v41 = vadd.f32 %v2310_v1, %v2966_v39  ;;  %v1325_v5 = vpop.f32.mrb[17].mxu0 }
 0x1c6   : > { %v1326_v6 = vadd.f32 %v2966_v39, %v1325_v5  ;;  %v2311_v9 = vpop.f32.mrb[18].mxu0 }
 0x1c7   : > { %v2206_v8 = vpack.c.bf16 %v1334_v41, %v1334_v41  ;;  %v1337_v7 = vadd.f32 %v2311_v9, %v2966_v39  ;;  %v1328_v10 = vpop.f32.mrb[19].mxu0 }
 0x1c8   : > { %v2204_v12 = vpack.c.bf16 %v1326_v6, %v1326_v6  ;;  %v1329_v14 = vadd.f32 %v2966_v39, %v1328_v10 }
 0x1c9   : > { %1535 = vst.msk [vmem:[%s2973_s11 + $0x90] sm:$0xf] %vm1516_vm12, %v2206_v8  ;;  %v2207_v15 = vpack.c.bf16 %v1337_v7, %v1337_v7 }
 0x1ca   : > { %1533 = vst.msk [vmem:[%s2973_s11 + $0x80] sm:$0xf] %vm1516_vm12, %v2204_v12  ;;  %v2205_v16 = vpack.c.bf16 %v1329_v14, %v1329_v14 }
 0x1cb   : > { %1536 = vst.msk [vmem:[%s2973_s11 + $0x94] sm:$0xf] %vm1516_vm12, %v2207_v15 }
 0x1cc   : > { %v2346_v17 = vpop.f32.mrb[16].mxu1  ;;  %1534 = vst.msk [vmem:[%s2973_s11 + $0x84] sm:$0xf] %vm1516_vm12, %v2205_v16 }
 0x1cd   : > { %v1711_v18 = vadd.f32 %v2346_v17, %v2966_v39  ;;  %v1702_v19 = vpop.f32.mrb[17].mxu1 }
 0x1ce   : > { %v1703_v30 = vadd.f32 %v2966_v39, %v1702_v19  ;;  %v2347_v27 = vpop.f32.mrb[18].mxu1 }
 0x1cf   : > { %v2238_v23 = vpack.c.bf16 %v1711_v18, %v1711_v18  ;;  %v1714_v24 = vadd.f32 %v2347_v27, %v2966_v39  ;;  %v1705_v38 = vpop.f32.mrb[19].mxu1 }
 0x1d0   : > { %v2236_v25 = vpack.c.bf16 %v1703_v30, %v1703_v30  ;;  %v1706_v32 = vadd.f32 %v2966_v39, %v1705_v38 }
 0x1d1   : > { %2170 = vst.msk [vmem:[%s2973_s11 + $0x98] sm:$0xf] %vm1516_vm12, %v2238_v23  ;;  %v2239_v26 = vpack.c.bf16 %v1714_v24, %v1714_v24 }
 0x1d2   : > { %2168 = vst.msk [vmem:[%s2973_s11 + $0x88] sm:$0xf] %vm1516_vm12, %v2236_v25  ;;  %v2237_v33 = vpack.c.bf16 %v1706_v32, %v1706_v32 }
 0x1d3   : > { %2171 = vst.msk [vmem:[%s2973_s11 + $0x9c] sm:$0xf] %vm1516_vm12, %v2239_v26 }
 0x1d4   : > { %2169 = vst.msk [vmem:[%s2973_s11 + $0x8c] sm:$0xf] %vm1516_vm12, %v2237_v33 }
 0x1d8   : > { %v2314_v36 = vpop.f32.mrb[20].mxu0 }
 0x1d9   : > { %v1350_v37 = vadd.f32 %v2314_v36, %v2966_v39  ;;  %v1341_v2 = vpop.f32.mrb[21].mxu0 }
 0x1da   : > { %v1342_v20 = vadd.f32 %v2966_v39, %v1341_v2  ;;  %v2315_v52 = vpop.f32.mrb[22].mxu0 }
 0x1db   : > { %v2210_v11 = vpack.c.bf16 %v1350_v37, %v1350_v37  ;;  %v1353_v40 = vadd.f32 %v2315_v52, %v2966_v39  ;;  %v1344_v42 = vpop.f32.mrb[23].mxu0 }
 0x1dc   : > { %v2208_v13 = vpack.c.bf16 %v1342_v20, %v1342_v20  ;;  %v1345_v43 = vadd.f32 %v2966_v39, %v1344_v42 }
 0x1dd   : > { %1539 = vst.msk [vmem:[%s2973_s11 + $0xb0] sm:$0xf] %vm1516_vm12, %v2210_v11  ;;  %v2211_v34 = vpack.c.bf16 %v1353_v40, %v1353_v40 }
 0x1de   : > { %1537 = vst.msk [vmem:[%s2973_s11 + $0xa0] sm:$0xf] %vm1516_vm12, %v2208_v13  ;;  %v2209_v55 = vpack.c.bf16 %v1345_v43, %v1345_v43 }
 0x1df   : > { %1540 = vst.msk [vmem:[%s2973_s11 + $0xb4] sm:$0xf] %vm1516_vm12, %v2211_v34 }
 0x1e0   : > { %v2350_v44 = vpop.f32.mrb[20].mxu1  ;;  %1538 = vst.msk [vmem:[%s2973_s11 + $0xa4] sm:$0xf] %vm1516_vm12, %v2209_v55 }
 0x1e1   : > { %v1727_v3 = vadd.f32 %v2350_v44, %v2966_v39  ;;  %v1718_v21 = vpop.f32.mrb[21].mxu1 }
 0x1e2   : > { %v1719_v4 = vadd.f32 %v2966_v39, %v1718_v21  ;;  %v2351_v46 = vpop.f32.mrb[22].mxu1 }
 0x1e3   : > { %v2242_v49 = vpack.c.bf16 %v1727_v3, %v1727_v3  ;;  %v1730_v35 = vadd.f32 %v2351_v46, %v2966_v39  ;;  %v1721_v50 = vpop.f32.mrb[23].mxu1 }
 0x1e4   : > { %v2240_v31 = vpack.c.bf16 %v1719_v4, %v1719_v4  ;;  %v1722_v22 = vadd.f32 %v2966_v39, %v1721_v50 }
 0x1e5   : > { %2174 = vst.msk [vmem:[%s2973_s11 + $0xb8] sm:$0xf] %vm1516_vm12, %v2242_v49  ;;  %v2243_v51 = vpack.c.bf16 %v1730_v35, %v1730_v35 }
 0x1e6   : > { %2172 = vst.msk [vmem:[%s2973_s11 + $0xa8] sm:$0xf] %vm1516_vm12, %v2240_v31  ;;  %v2241_v29 = vpack.c.bf16 %v1722_v22, %v1722_v22 }
 0x1e7   : > { %2175 = vst.msk [vmem:[%s2973_s11 + $0xbc] sm:$0xf] %vm1516_vm12, %v2243_v51 }
 0x1e8   : > { %2173 = vst.msk [vmem:[%s2973_s11 + $0xac] sm:$0xf] %vm1516_vm12, %v2241_v29 }
 0x1ed   : > { %v2318_v53 = vpop.f32.mrb[24].mxu0 }
 0x1ee   : > { %v1366_v54 = vadd.f32 %v2318_v53, %v2966_v39  ;;  %v1357_v56 = vpop.f32.mrb[25].mxu0 }
 0x1ef   : > { %v1358_v57 = vadd.f32 %v2966_v39, %v1357_v56  ;;  %v2319_v28 = vpop.f32.mrb[26].mxu0 }
 0x1f0   : > { %v2214_v45 = vpack.c.bf16 %v1366_v54, %v1366_v54  ;;  %v1369_v58 = vadd.f32 %v2319_v28, %v2966_v39  ;;  %v1360_v59 = vpop.f32.mrb[27].mxu0 }
 0x1f1   : > { %v2212_v48 = vpack.c.bf16 %v1358_v57, %v1358_v57  ;;  %v1361_v47 = vadd.f32 %v2966_v39, %v1360_v59 }
 0x1f2   : > { %1543 = vst.msk [vmem:[%s2973_s11 + $0xd0] sm:$0xf] %vm1516_vm12, %v2214_v45  ;;  %v2215_v60 = vpack.c.bf16 %v1369_v58, %v1369_v58 }
 0x1f3   : > { %1541 = vst.msk [vmem:[%s2973_s11 + $0xc0] sm:$0xf] %vm1516_vm12, %v2212_v48  ;;  %v2213_v61 = vpack.c.bf16 %v1361_v47, %v1361_v47 }
 0x1f4   : > { %1544 = vst.msk [vmem:[%s2973_s11 + $0xd4] sm:$0xf] %vm1516_vm12, %v2215_v60  ;;  %v2354_v62 = vpop.f32.mrb[24].mxu1 }
 0x1f5   : > { %1542 = vst.msk [vmem:[%s2973_s11 + $0xc4] sm:$0xf] %vm1516_vm12, %v2213_v61  ;;  %v1743_v63 = vadd.f32 %v2354_v62, %v2966_v39  ;;  %v1734_v0 = vpop.f32.mrb[25].mxu1 }
 0x1f6   : > { %v1735_v1 = vadd.f32 %v2966_v39, %v1734_v0  ;;  %v2355_v41 = vpop.f32.mrb[26].mxu1 }
 0x1f7   : > { %v2246_v5 = vpack.c.bf16 %v1743_v63, %v1743_v63  ;;  %v1746_v6 = vadd.f32 %v2355_v41, %v2966_v39  ;;  %v1737_v9 = vpop.f32.mrb[27].mxu1 }
 0x1f8   : > { %v2244_v8 = vpack.c.bf16 %v1735_v1, %v1735_v1  ;;  %v1738_v7 = vadd.f32 %v2966_v39, %v1737_v9 }
 0x1f9   : > { %2178 = vst.msk [vmem:[%s2973_s11 + $0xd8] sm:$0xf] %vm1516_vm12, %v2246_v5  ;;  %v2247_v10 = vpack.c.bf16 %v1746_v6, %v1746_v6 }
 0x1fa   : > { %2176 = vst.msk [vmem:[%s2973_s11 + $0xc8] sm:$0xf] %vm1516_vm12, %v2244_v8  ;;  %v2245_v12 = vpack.c.bf16 %v1738_v7, %v1738_v7 }
 0x1fb   : > { %2179 = vst.msk [vmem:[%s2973_s11 + $0xdc] sm:$0xf] %vm1516_vm12, %v2247_v10 }
 0x1fc   : > { %2177 = vst.msk [vmem:[%s2973_s11 + $0xcc] sm:$0xf] %vm1516_vm12, %v2245_v12 }
 0x204   : > { %v2322_v14 = vpop.f32.mrb[28].mxu0 }
 0x205   : > { %v1382_v15 = vadd.f32 %v2322_v14, %v2966_v39  ;;  %v1373_v16 = vpop.f32.mrb[29].mxu0 }
 0x206   : > { %v1374_v17 = vadd.f32 %v2966_v39, %v1373_v16  ;;  %v2323_v18 = vpop.f32.mrb[30].mxu0 }
 0x207   : > { %v2218_v19 = vpack.c.bf16 %v1382_v15, %v1382_v15  ;;  %v1385_v30 = vadd.f32 %v2323_v18, %v2966_v39  ;;  %v1376_v27 = vpop.f32.mrb[31].mxu0 }
 0x208   : > { %v2216_v23 = vpack.c.bf16 %v1374_v17, %v1374_v17  ;;  %v1377_v24 = vadd.f32 %v2966_v39, %v1376_v27  ;;  %v2358_v38 = vpop.f32.mrb[28].mxu1 }
 0x209   : > { %1547 = vst.msk [vmem:[%s2973_s11 + $0xf0] sm:$0xf] %vm1516_vm12, %v2218_v19  ;;  %v2219_v25 = vpack.c.bf16 %v1385_v30, %v1385_v30  ;;  %v1759_v32 = vadd.f32 %v2358_v38, %v2966_v39  ;;  %v1750_v26 = vpop.f32.mrb[29].mxu1 }
 0x20a   : > { %1545 = vst.msk [vmem:[%s2973_s11 + $0xe0] sm:$0xf] %vm1516_vm12, %v2216_v23  ;;  %v2217_v33 = vpack.c.bf16 %v1377_v24, %v1377_v24  ;;  %v1751_v36 = vadd.f32 %v2966_v39, %v1750_v26  ;;  %v2359_v37 = vpop.f32.mrb[30].mxu1 }
 0x20b   : > { %1548 = vst.msk [vmem:[%s2973_s11 + $0xf4] sm:$0xf] %vm1516_vm12, %v2219_v25  ;;  %v2250_v2 = vpack.c.bf16 %v1759_v32, %v1759_v32  ;;  %v1762_v20 = vadd.f32 %v2359_v37, %v2966_v39  ;;  %v1753_v52 = vpop.f32.mrb[31].mxu1 }
 0x20c   : > { %1546 = vst.msk [vmem:[%s2973_s11 + $0xe4] sm:$0xf] %vm1516_vm12, %v2217_v33  ;;  %v2248_v11 = vpack.c.bf16 %v1751_v36, %v1751_v36  ;;  %v1754_v40 = vadd.f32 %v2966_v39, %v1753_v52 }
 0x20d   : > { %2182 = vst.msk [vmem:[%s2973_s11 + $0xf8] sm:$0xf] %vm1516_vm12, %v2250_v2  ;;  %v2251_v42 = vpack.c.bf16 %v1762_v20, %v1762_v20 }
 0x20e   : > { %2180 = vst.msk [vmem:[%s2973_s11 + $0xe8] sm:$0xf] %vm1516_vm12, %v2248_v11  ;;  %v2249_v13 = vpack.c.bf16 %v1754_v40, %v1754_v40 }
 0x20f   : > { %2183 = vst.msk [vmem:[%s2973_s11 + $0xfc] sm:$0xf] %vm1516_vm12, %v2251_v42 }
 0x210   : > { %2181 = vst.msk [vmem:[%s2973_s11 + $0xec] sm:$0xf] %vm1516_vm12, %v2249_v13 }
 0x211 PF: > { %s13_s14 = sadd.s32 1, %s2434_s14   ;;  %s3181_s12 = smov %s2430_s13 }
 0x212   : > { %p10_p5 = scmp.ge.s32.totalorder %s13_s14, 4   ;;  %s3182_s13 = smov %s3184_s15 }
 0x214   :  { %12 = sbr.rel (!%p10_p5) target bundleno = 2 (0x2), region = 67 }

</bundles_post_ra>
